<compile_context>
chip_gen: v7x
topology: tpu7x:2x2x1
jax: 0.10.0
libtpu: 0.0.40
codegen_flags: <defaults>
</compile_context>

<pallas_src>
import numpy as np
import jax
import jax.numpy as jnp
from jax import lax
from jax.experimental import pallas as pl
from jax.experimental.pallas import tpu as pltpu


def _smallnet_kernel(x_ref, w1_ref, b1_ref, w2_ref, b2_ref,
                     wf1_ref, bf1_ref, wf2_ref, bf2_ref,
                     out_ref, p1_ref, a1_ref, p2_ref):
    """One batch block of SmallNet.

    x_ref  : [TB, 28, 28] f32
    w1_ref : [140, 256] bf16  conv1 im2col weights (cols 0:120 even-w | 128:248 odd-w)
    b1_ref : [1, 128]   f32   conv1 bias tiled on lane co*12 + wp
    w2_ref : [640, 256] bf16  conv2 im2col weights (cols 0:80 even-w | 128:208 odd-w)
    b2_ref : [1, 128]   f32   conv2 bias tiled on lane co*4 + wp
    wf1_ref: [4, 128, 50] f32 fc1 weights banded per pooled row hp
    out_ref: [TB, 10]   f32   log-probabilities
    p1_ref : [TB, 24, 128] f32 width-pooled conv1 (lane = co*12 + wp)
    a1_ref : [TB, 12, 128] f32 pool1 + bias + ReLU output
    p2_ref : [TB, 8, 128]  f32 width-pooled conv2 (lane = co*4 + wp)
    """
    f32, bf16 = jnp.float32, jnp.bfloat16
    tb = x_ref.shape[0]

    # ---- conv1 (1 -> 10, 5x5 valid) as ONE im2col matmul on the MXU ----
    # xcol[(n,h), kh*28 + wi] = x[n, h + kh, wi]
    xcol = jnp.concatenate([x_ref[:, pl.ds(kh, 24), :] for kh in range(5)], axis=-1)
    xcol = xcol.reshape(tb * 24, 140).astype(bf16)
    c1 = jnp.dot(xcol, w1_ref[...], preferred_element_type=f32)       # [tb*24, 256]
    # width max-pool = aligned half-vs-half max (even-w half | odd-w half)
    p1_ref[...] = jnp.maximum(c1[:, 0:128], c1[:, 128:256]).reshape(tb, 24, 128)

    # ---- pool1 height (stride-2 sublane reads) + bias + ReLU ----
    a1 = jnp.maximum(p1_ref[:, pl.ds(0, 12, 2), :], p1_ref[:, pl.ds(1, 12, 2), :])
    a1_ref[...] = jnp.maximum(a1 + b1_ref[...], 0.0)                  # [tb, 12, 128]

    # ---- conv2 (10 -> 20, 5x5 valid) as ONE im2col matmul ----
    a1col = jnp.concatenate([a1_ref[:, pl.ds(kh, 8), :] for kh in range(5)], axis=-1)
    a1col = a1col.reshape(tb * 8, 640).astype(bf16)
    c2 = jnp.dot(a1col, w2_ref[...], preferred_element_type=f32)      # [tb*8, 256]
    p2_ref[...] = jnp.maximum(c2[:, 0:128], c2[:, 128:256]).reshape(tb, 8, 128)

    # ---- pool2 height + bias + ReLU fused into fc1 (4 accumulated matmuls) ----
    z1 = jnp.zeros((tb, 50), f32)
    for hp in range(4):
        q = jnp.maximum(p2_ref[:, pl.ds(2 * hp, 1), :],
                        p2_ref[:, pl.ds(2 * hp + 1, 1), :]).reshape(tb, 128)
        a2 = jnp.maximum(q + b2_ref[...], 0.0)
        z1 = z1 + jnp.dot(a2, wf1_ref[hp], preferred_element_type=f32)
    z1 = jnp.maximum(z1 + bf1_ref[...], 0.0)                          # [tb, 50]

    # ---- fc2 (50 -> 10) + log_softmax ----
    z2 = jnp.dot(z1, wf2_ref[...], preferred_element_type=f32) + bf2_ref[...]
    m = jnp.max(z2, axis=1, keepdims=True)
    lse = jnp.log(jnp.sum(jnp.exp(z2 - m), axis=1, keepdims=True))
    out_ref[...] = z2 - m - lse


def smallnet_forward(x_nchw, params, *, block_batch=128):
    """x_nchw: [N, 1, 28, 28] f32 (PyTorch layout). Returns [N, 10] log-probs."""
    (w1c, b1t, w2c, b2t, wf1h, bf1t, wf2t, bf2t) = params
    n = x_nchw.shape[0]
    x = x_nchw.reshape(n, 28, 28).astype(jnp.float32)

    if n <= 8:
        tb = n                                        # tiny batch: single grid step
    else:
        half = -(-n // 2)                             # ceil(n/2)
        half8 = -(-half // 8) * 8                     # rounded up to sublane multiple
        tb = max(8, min((int(block_batch) // 8) * 8, half8))   # >= 2 grid steps
    n_pad = int(pl.cdiv(n, tb)) * tb
    if n_pad != n:
        x = jnp.pad(x, ((0, n_pad - n), (0, 0), (0, 0)))

    out = pl.pallas_call(
        _smallnet_kernel,
        out_shape=jax.ShapeDtypeStruct((n_pad, 10), jnp.float32),
        grid_spec=pltpu.PrefetchScalarGridSpec(
            num_scalar_prefetch=0,
            grid=(n_pad // tb,),
            in_specs=[
                pl.BlockSpec((tb, 28, 28), lambda b: (b, 0, 0)),    # x (batch-blocked)
                pl.BlockSpec((140, 256), lambda b: (0, 0)),         # conv1 im2col weights
                pl.BlockSpec((1, 128), lambda b: (0, 0)),           # conv1 bias tile
                pl.BlockSpec((640, 256), lambda b: (0, 0)),         # conv2 im2col weights
                pl.BlockSpec((1, 128), lambda b: (0, 0)),           # conv2 bias tile
                pl.BlockSpec((4, 128, 50), lambda b: (0, 0, 0)),    # fc1 banded weights
                pl.BlockSpec((1, 50), lambda b: (0, 0)),            # fc1 bias
                pl.BlockSpec((50, 10), lambda b: (0, 0)),           # fc2 weights
                pl.BlockSpec((1, 10), lambda b: (0, 0)),            # fc2 bias
            ],
            out_specs=pl.BlockSpec((tb, 10), lambda b: (b, 0)),
            scratch_shapes=[
                pltpu.VMEM((tb, 24, 128), jnp.float32),   # width-pooled conv1
                pltpu.VMEM((tb, 12, 128), jnp.float32),   # pool1 + ReLU output
                pltpu.VMEM((tb, 8, 128), jnp.float32),    # width-pooled conv2
            ],
        ),
        compiler_params=pltpu.CompilerParams(
            dimension_semantics=("parallel",),            # megacore batch split on v7x
            vmem_limit_bytes=48 * 1024 * 1024),
    )(x, w1c, b1t, w2c, b2t, wf1h, bf1t, wf2t, bf2t)
    return out[:n]


def prepare_params(Wc1, bc1, Wc2, bc2, Wf1, bf1, Wf2, bf2):
    """Build kernel-layout (im2col / width-parity-split) weights from PyTorch params."""
    Wc1 = np.asarray(Wc1, np.float32); bc1 = np.asarray(bc1, np.float32)
    Wc2 = np.asarray(Wc2, np.float32); bc2 = np.asarray(bc2, np.float32)
    Wf1 = np.asarray(Wf1, np.float32); bf1 = np.asarray(bf1, np.float32)
    Wf2 = np.asarray(Wf2, np.float32); bf2 = np.asarray(bf2, np.float32)

    # conv1 im2col: row = kh*28 + wi; col = co*12 + wp (output w = 2wp) or
    # 128 + co*12 + wp (output w = 2wp+1).  Columns 120..127 / 248..255 stay zero.
    w1c = np.zeros((140, 256), np.float32)
    for co in range(10):
        for wp in range(12):
            for kh in range(5):
                for kw in range(5):
                    w1c[kh * 28 + 2 * wp + kw, co * 12 + wp] = Wc1[co, 0, kh, kw]
                    w1c[kh * 28 + 2 * wp + 1 + kw, 128 + co * 12 + wp] = Wc1[co, 0, kh, kw]
    b1t = np.zeros((1, 128), np.float32)
    for co in range(10):
        b1t[0, co * 12:(co + 1) * 12] = bc1[co]

    # conv2 im2col over 5 aligned 128-lane bands of pooled conv1 (lane = ci*12 + wi):
    # row = kh*128 + ci*12 + (w + kw); col = co*4 + wp (even w) / 128 + co*4 + wp (odd w).
    w2c = np.zeros((640, 256), np.float32)
    for co in range(20):
        for wp in range(4):
            for ci in range(10):
                for kh in range(5):
                    for kw in range(5):
                        w2c[kh * 128 + ci * 12 + 2 * wp + kw, co * 4 + wp] = Wc2[co, ci, kh, kw]
                        w2c[kh * 128 + ci * 12 + 2 * wp + 1 + kw, 128 + co * 4 + wp] = Wc2[co, ci, kh, kw]
    b2t = np.zeros((1, 128), np.float32)
    for co in range(20):
        b2t[0, co * 4:(co + 1) * 4] = bc2[co]

    # fc1 banded per pooled row hp; torch flatten index = co*16 + hp*4 + wp.
    wf1h = np.zeros((4, 128, 50), np.float32)
    for hp in range(4):
        for co in range(20):
            for wp in range(4):
                wf1h[hp, co * 4 + wp, :] = Wf1[:, co * 16 + hp * 4 + wp]

    return (jnp.asarray(w1c, dtype=jnp.bfloat16), jnp.asarray(b1t),
            jnp.asarray(w2c, dtype=jnp.bfloat16), jnp.asarray(b2t),
            jnp.asarray(wf1h), jnp.asarray(bf1.reshape(1, 50)),
            jnp.asarray(Wf2.T.copy()), jnp.asarray(bf2.reshape(1, 10)))


def torch_style_reference(x, Wc1, bc1, Wc2, bc2, Wf1, bf1, Wf2, bf2):
    """Pure-JAX NCHW reference mirroring the PyTorch module exactly."""
    hp = lax.Precision.HIGHEST
    dn = ('NCHW', 'OIHW', 'NCHW')
    y = lax.conv_general_dilated(x, Wc1, (1, 1), 'VALID', dimension_numbers=dn,
                                 precision=hp) + bc1[None, :, None, None]
    y = lax.reduce_window(y, -jnp.inf, lax.max, (1, 1, 2, 2), (1, 1, 2, 2), 'VALID')
    y = jnp.maximum(y, 0.0)
    y = lax.conv_general_dilated(y, Wc2, (1, 1), 'VALID', dimension_numbers=dn,
                                 precision=hp) + bc2[None, :, None, None]
    y = lax.reduce_window(y, -jnp.inf, lax.max, (1, 1, 2, 2), (1, 1, 2, 2), 'VALID')
    y = jnp.maximum(y, 0.0)
    z = y.reshape(y.shape[0], -1)                          # == torch .view(-1, 320)
    z = jnp.maximum(jnp.dot(z, Wf1.T, precision=hp) + bf1, 0.0)
    z = jnp.dot(z, Wf2.T, precision=hp) + bf2
    return jax.nn.log_softmax(z, axis=1)


if __name__ == "__main__":
    key = jax.random.PRNGKey(0)
    ks = jax.random.split(key, 10)

    def uinit(k, shape, fan_in):
        b = 1.0 / np.sqrt(fan_in)
        return jax.random.uniform(k, shape, jnp.float32, -b, b)

    # PyTorch-shaped parameters (deterministic synthetic init).
    Wc1 = uinit(ks[0], (10, 1, 5, 5), 25)      # conv1.weight [Cout,Cin,KH,KW]
    bc1 = uinit(ks[1], (10,), 25)
    Wc2 = uinit(ks[2], (20, 10, 5, 5), 250)    # conv2.weight
    bc2 = uinit(ks[3], (20,), 250)
    Wf1 = uinit(ks[4], (50, 320), 320)         # fc1.weight [out,in]
    bf1 = uinit(ks[5], (50,), 320)
    Wf2 = uinit(ks[6], (10, 50), 50)           # fc2.weight
    bf2 = uinit(ks[7], (10,), 50)

    params = prepare_params(Wc1, bc1, Wc2, bc2, Wf1, bf1, Wf2, bf2)

    fwd = jax.jit(smallnet_forward, static_argnames=("block_batch",))
    ref_fn = jax.jit(torch_style_reference)

    # Tolerance: conv1/conv2 use bf16 MXU operands (f32 accumulate); layout bugs
    # would show up as O(0.1..1) errors, so 2e-2 still catches anything real.
    TOL = 2e-2

    # Test 1: batch=2 (single grid step), the spec's small-shape demo.
    x2 = jax.random.normal(ks[8], (2, 1, 28, 28), jnp.float32)
    out2 = jax.block_until_ready(fwd(x2, params))
    ref2 = jax.block_until_ready(ref_fn(x2, Wc1, bc1, Wc2, bc2, Wf1, bf1, Wf2, bf2))
    assert out2.shape == (2, 10)
    d2 = float(np.max(np.abs(np.asarray(out2) - np.asarray(ref2))))
    assert d2 < TOL, f"batch=2 mismatch vs reference: max|diff|={d2}"

    # Test 2: batch=12 -> 2-step parallel grid (tb=8) + batch padding to 16.
    x12 = jax.random.normal(ks[9], (12, 1, 28, 28), jnp.float32)
    out12 = jax.block_until_ready(fwd(x12, params))
    ref12 = jax.block_until_ready(ref_fn(x12, Wc1, bc1, Wc2, bc2, Wf1, bf1, Wf2, bf2))
    assert out12.shape == (12, 10)
    d12 = float(np.max(np.abs(np.asarray(out12) - np.asarray(ref12))))
    assert d12 < TOL, f"batch=12 mismatch vs reference: max|diff|={d12}"

    print("KERNEL_OK")
</pallas_src>

<mosaic_0001>
module attributes {stable_mosaic.version = 11 : i64} {
  func.func @_smallnet_kernel(%arg0: i32, %arg1: memref<2x28x28xf32, #tpu.memory_space<vmem>>, %arg2: memref<140x256xbf16, #tpu.memory_space<vmem>>, %arg3: memref<1x128xf32, #tpu.memory_space<vmem>>, %arg4: memref<640x256xbf16, #tpu.memory_space<vmem>>, %arg5: memref<1x128xf32, #tpu.memory_space<vmem>>, %arg6: memref<4x128x50xf32, #tpu.memory_space<vmem>>, %arg7: memref<1x50xf32, #tpu.memory_space<vmem>>, %arg8: memref<50x10xf32, #tpu.memory_space<vmem>>, %arg9: memref<1x10xf32, #tpu.memory_space<vmem>>, %arg10: memref<2x10xf32, #tpu.memory_space<vmem>>, %arg11: memref<2x24x128xf32, #tpu.memory_space<vmem>>, %arg12: memref<2x12x128xf32, #tpu.memory_space<vmem>>, %arg13: memref<2x8x128xf32, #tpu.memory_space<vmem>>) attributes {dimension_semantics = [#tpu.dimension_semantics<parallel>], iteration_bounds = array<i64: 1>, scalar_prefetch = 0 : i64, scratch_operands = 3 : i64, tpu.core_type = #tpu.core_type<tc>, window_params = [{transform_indices = @transform_0, window_bounds = array<i64: 2, 28, 28>}, {pipeline_mode = #tpu.pipeline_mode<synchronous>, transform_indices = @transform_1, window_bounds = array<i64: 140, 256>}, {pipeline_mode = #tpu.pipeline_mode<synchronous>, transform_indices = @transform_2, window_bounds = array<i64: 1, 128>}, {pipeline_mode = #tpu.pipeline_mode<synchronous>, transform_indices = @transform_3, window_bounds = array<i64: 640, 256>}, {pipeline_mode = #tpu.pipeline_mode<synchronous>, transform_indices = @transform_4, window_bounds = array<i64: 1, 128>}, {pipeline_mode = #tpu.pipeline_mode<synchronous>, transform_indices = @transform_5, window_bounds = array<i64: 4, 128, 50>}, {pipeline_mode = #tpu.pipeline_mode<synchronous>, transform_indices = @transform_6, window_bounds = array<i64: 1, 50>}, {pipeline_mode = #tpu.pipeline_mode<synchronous>, transform_indices = @transform_7, window_bounds = array<i64: 50, 10>}, {pipeline_mode = #tpu.pipeline_mode<synchronous>, transform_indices = @transform_8, window_bounds = array<i64: 1, 10>}, {transform_indices = @transform_9, window_bounds = array<i64: 2, 10>}]} {
    %c0 = arith.constant 0 : index
    %c0_0 = arith.constant 0 : index
    %c0_1 = arith.constant 0 : index
    %0 = vector.load %arg1[%c0, %c0_0, %c0_1] : memref<2x28x28xf32, #tpu.memory_space<vmem>>, vector<2x24x28xf32>
    %c0_2 = arith.constant 0 : index
    %c1 = arith.constant 1 : index
    %c0_3 = arith.constant 0 : index
    %1 = vector.load %arg1[%c0_2, %c1, %c0_3] : memref<2x28x28xf32, #tpu.memory_space<vmem>>, vector<2x24x28xf32>
    %c0_4 = arith.constant 0 : index
    %c2 = arith.constant 2 : index
    %c0_5 = arith.constant 0 : index
    %2 = vector.load %arg1[%c0_4, %c2, %c0_5] : memref<2x28x28xf32, #tpu.memory_space<vmem>>, vector<2x24x28xf32>
    %c0_6 = arith.constant 0 : index
    %c3 = arith.constant 3 : index
    %c0_7 = arith.constant 0 : index
    %3 = vector.load %arg1[%c0_6, %c3, %c0_7] : memref<2x28x28xf32, #tpu.memory_space<vmem>>, vector<2x24x28xf32>
    %c0_8 = arith.constant 0 : index
    %c4 = arith.constant 4 : index
    %c0_9 = arith.constant 0 : index
    %4 = vector.load %arg1[%c0_8, %c4, %c0_9] : memref<2x28x28xf32, #tpu.memory_space<vmem>>, vector<2x24x28xf32>
    %5 = tpu.concatenate %0, %1, %2, %3, %4 in 2 : vector<2x24x28xf32>, vector<2x24x28xf32>, vector<2x24x28xf32>, vector<2x24x28xf32>, vector<2x24x28xf32> -> vector<2x24x140xf32>
    %6 = vector.shape_cast %5 : vector<2x24x140xf32> to vector<48x140xf32>
    %7 = arith.truncf %6 : vector<48x140xf32> to vector<48x140xbf16>
    %c0_10 = arith.constant 0 : index
    %c0_11 = arith.constant 0 : index
    %8 = vector.load %arg2[%c0_10, %c0_11] : memref<140x256xbf16, #tpu.memory_space<vmem>>, vector<140x256xbf16>
    %cst = arith.constant dense<0.000000e+00> : vector<48x256xf32>
    %9 = tpu.matmul %7, %8, %cst {dimension_numbers = #tpu.dot_dimension_numbers<[1], [0], [0], [1], [0, 0, 1, 1], [], []>} : vector<48x140xbf16>, vector<140x256xbf16>, vector<48x256xf32> -> vector<48x256xf32>
    %10 = vector.extract_strided_slice %9 {offsets = [0, 0], sizes = [48, 128], strides = [1, 1]} : vector<48x256xf32> to vector<48x128xf32>
    %11 = vector.extract_strided_slice %9 {offsets = [0, 128], sizes = [48, 128], strides = [1, 1]} : vector<48x256xf32> to vector<48x128xf32>
    %12 = arith.maximumf %10, %11 : vector<48x128xf32>
    %13 = vector.shape_cast %12 : vector<48x128xf32> to vector<2x24x128xf32>
    %c0_12 = arith.constant 0 : index
    %c0_13 = arith.constant 0 : index
    %c0_14 = arith.constant 0 : index
    %14 = vector.load %arg11[%c0_12, %c0_13, %c0_14] : memref<2x24x128xf32, #tpu.memory_space<vmem>>, vector<2x24x128xf32>
    tpu.vector_store %arg11[%c0_12, %c0_13, %c0_14], %13 {strides = array<i32>} : memref<2x24x128xf32, #tpu.memory_space<vmem>>, vector<2x24x128xf32>,
    %c0_15 = arith.constant 0 : index
    %c0_16 = arith.constant 0 : index
    %c0_17 = arith.constant 0 : index
    %15 = tpu.strided_load %arg11[%c0_15, %c0_16, %c0_17] {strides = array<i32: 1, 2, 1>} : memref<2x24x128xf32, #tpu.memory_space<vmem>>, vector<2x12x128xf32>
    %c0_18 = arith.constant 0 : index
    %c1_19 = arith.constant 1 : index
    %c0_20 = arith.constant 0 : index
    %16 = tpu.strided_load %arg11[%c0_18, %c1_19, %c0_20] {strides = array<i32: 1, 2, 1>} : memref<2x24x128xf32, #tpu.memory_space<vmem>>, vector<2x12x128xf32>
    %17 = arith.maximumf %15, %16 : vector<2x12x128xf32>
    %c0_21 = arith.constant 0 : index
    %c0_22 = arith.constant 0 : index
    %18 = vector.load %arg3[%c0_21, %c0_22] : memref<1x128xf32, #tpu.memory_space<vmem>>, vector<1x128xf32>
    %19 = vector.shape_cast %18 : vector<1x128xf32> to vector<1x1x128xf32>
    %20 = vector.broadcast %19 : vector<1x1x128xf32> to vector<2x12x128xf32>
    %21 = arith.addf %17, %20 : vector<2x12x128xf32>
    %cst_23 = arith.constant 0.000000e+00 : f32
    %22 = vector.broadcast %cst_23 : f32 to vector<2x12x128xf32>
    %23 = arith.maximumf %21, %22 : vector<2x12x128xf32>
    %c0_24 = arith.constant 0 : index
    %c0_25 = arith.constant 0 : index
    %c0_26 = arith.constant 0 : index
    %24 = vector.load %arg12[%c0_24, %c0_25, %c0_26] : memref<2x12x128xf32, #tpu.memory_space<vmem>>, vector<2x12x128xf32>
    tpu.vector_store %arg12[%c0_24, %c0_25, %c0_26], %23 {strides = array<i32>} : memref<2x12x128xf32, #tpu.memory_space<vmem>>, vector<2x12x128xf32>,
    %c0_27 = arith.constant 0 : index
    %c0_28 = arith.constant 0 : index
    %c0_29 = arith.constant 0 : index
    %25 = vector.load %arg12[%c0_27, %c0_28, %c0_29] : memref<2x12x128xf32, #tpu.memory_space<vmem>>, vector<2x8x128xf32>
    %c0_30 = arith.constant 0 : index
    %c1_31 = arith.constant 1 : index
    %c0_32 = arith.constant 0 : index
    %26 = vector.load %arg12[%c0_30, %c1_31, %c0_32] : memref<2x12x128xf32, #tpu.memory_space<vmem>>, vector<2x8x128xf32>
    %c0_33 = arith.constant 0 : index
    %c2_34 = arith.constant 2 : index
    %c0_35 = arith.constant 0 : index
    %27 = vector.load %arg12[%c0_33, %c2_34, %c0_35] : memref<2x12x128xf32, #tpu.memory_space<vmem>>, vector<2x8x128xf32>
    %c0_36 = arith.constant 0 : index
    %c3_37 = arith.constant 3 : index
    %c0_38 = arith.constant 0 : index
    %28 = vector.load %arg12[%c0_36, %c3_37, %c0_38] : memref<2x12x128xf32, #tpu.memory_space<vmem>>, vector<2x8x128xf32>
    %c0_39 = arith.constant 0 : index
    %c4_40 = arith.constant 4 : index
    %c0_41 = arith.constant 0 : index
    %29 = vector.load %arg12[%c0_39, %c4_40, %c0_41] : memref<2x12x128xf32, #tpu.memory_space<vmem>>, vector<2x8x128xf32>
    %30 = tpu.concatenate %25, %26, %27, %28, %29 in 2 : vector<2x8x128xf32>, vector<2x8x128xf32>, vector<2x8x128xf32>, vector<2x8x128xf32>, vector<2x8x128xf32> -> vector<2x8x640xf32>
    %31 = vector.shape_cast %30 : vector<2x8x640xf32> to vector<16x640xf32>
    %32 = arith.truncf %31 : vector<16x640xf32> to vector<16x640xbf16>
    %c0_42 = arith.constant 0 : index
    %c0_43 = arith.constant 0 : index
    %33 = vector.load %arg4[%c0_42, %c0_43] : memref<640x256xbf16, #tpu.memory_space<vmem>>, vector<640x256xbf16>
    %cst_44 = arith.constant dense<0.000000e+00> : vector<16x256xf32>
    %34 = tpu.matmul %32, %33, %cst_44 {dimension_numbers = #tpu.dot_dimension_numbers<[1], [0], [0], [1], [0, 0, 1, 1], [], []>} : vector<16x640xbf16>, vector<640x256xbf16>, vector<16x256xf32> -> vector<16x256xf32>
    %35 = vector.extract_strided_slice %34 {offsets = [0, 0], sizes = [16, 128], strides = [1, 1]} : vector<16x256xf32> to vector<16x128xf32>
    %36 = vector.extract_strided_slice %34 {offsets = [0, 128], sizes = [16, 128], strides = [1, 1]} : vector<16x256xf32> to vector<16x128xf32>
    %37 = arith.maximumf %35, %36 : vector<16x128xf32>
    %38 = vector.shape_cast %37 : vector<16x128xf32> to vector<2x8x128xf32>
    %c0_45 = arith.constant 0 : index
    %c0_46 = arith.constant 0 : index
    %c0_47 = arith.constant 0 : index
    %39 = vector.load %arg13[%c0_45, %c0_46, %c0_47] : memref<2x8x128xf32, #tpu.memory_space<vmem>>, vector<2x8x128xf32>
    tpu.vector_store %arg13[%c0_45, %c0_46, %c0_47], %38 {strides = array<i32>} : memref<2x8x128xf32, #tpu.memory_space<vmem>>, vector<2x8x128xf32>,
    %cst_48 = arith.constant 0.000000e+00 : f32
    %40 = vector.broadcast %cst_48 : f32 to vector<2x50xf32>
    %c0_49 = arith.constant 0 : index
    %c0_50 = arith.constant 0 : index
    %c0_51 = arith.constant 0 : index
    %41 = vector.load %arg13[%c0_49, %c0_50, %c0_51] : memref<2x8x128xf32, #tpu.memory_space<vmem>>, vector<2x1x128xf32>
    %c0_52 = arith.constant 0 : index
    %c1_53 = arith.constant 1 : index
    %c0_54 = arith.constant 0 : index
    %42 = vector.load %arg13[%c0_52, %c1_53, %c0_54] : memref<2x8x128xf32, #tpu.memory_space<vmem>>, vector<2x1x128xf32>
    %43 = arith.maximumf %41, %42 : vector<2x1x128xf32>
    %44 = vector.shape_cast %43 : vector<2x1x128xf32> to vector<2x128xf32>
    %c0_55 = arith.constant 0 : index
    %c0_56 = arith.constant 0 : index
    %45 = vector.load %arg5[%c0_55, %c0_56] : memref<1x128xf32, #tpu.memory_space<vmem>>, vector<1x128xf32>
    %46 = vector.broadcast %45 : vector<1x128xf32> to vector<2x128xf32>
    %47 = arith.addf %44, %46 : vector<2x128xf32>
    %cst_57 = arith.constant 0.000000e+00 : f32
    %48 = vector.broadcast %cst_57 : f32 to vector<2x128xf32>
    %49 = arith.maximumf %47, %48 : vector<2x128xf32>
    %c0_58 = arith.constant 0 : index
    %c0_59 = arith.constant 0 : index
    %c0_60 = arith.constant 0 : index
    %50 = vector.load %arg6[%c0_58, %c0_59, %c0_60] : memref<4x128x50xf32, #tpu.memory_space<vmem>>, vector<1x128x50xf32>
    %51 = vector.shape_cast %50 : vector<1x128x50xf32> to vector<128x50xf32>
    %cst_61 = arith.constant dense<0.000000e+00> : vector<2x50xf32>
    %52 = tpu.matmul %49, %51, %cst_61 {dimension_numbers = #tpu.dot_dimension_numbers<[1], [0], [0], [1], [0, 0, 1, 1], [], []>} : vector<2x128xf32>, vector<128x50xf32>, vector<2x50xf32> -> vector<2x50xf32>
    %53 = arith.addf %40, %52 : vector<2x50xf32>
    %c0_62 = arith.constant 0 : index
    %c2_63 = arith.constant 2 : index
    %c0_64 = arith.constant 0 : index
    %54 = vector.load %arg13[%c0_62, %c2_63, %c0_64] : memref<2x8x128xf32, #tpu.memory_space<vmem>>, vector<2x1x128xf32>
    %c0_65 = arith.constant 0 : index
    %c3_66 = arith.constant 3 : index
    %c0_67 = arith.constant 0 : index
    %55 = vector.load %arg13[%c0_65, %c3_66, %c0_67] : memref<2x8x128xf32, #tpu.memory_space<vmem>>, vector<2x1x128xf32>
    %56 = arith.maximumf %54, %55 : vector<2x1x128xf32>
    %57 = vector.shape_cast %56 : vector<2x1x128xf32> to vector<2x128xf32>
    %c0_68 = arith.constant 0 : index
    %c0_69 = arith.constant 0 : index
    %58 = vector.load %arg5[%c0_68, %c0_69] : memref<1x128xf32, #tpu.memory_space<vmem>>, vector<1x128xf32>
    %59 = vector.broadcast %58 : vector<1x128xf32> to vector<2x128xf32>
    %60 = arith.addf %57, %59 : vector<2x128xf32>
    %cst_70 = arith.constant 0.000000e+00 : f32
    %61 = vector.broadcast %cst_70 : f32 to vector<2x128xf32>
    %62 = arith.maximumf %60, %61 : vector<2x128xf32>
    %c1_71 = arith.constant 1 : index
    %c0_72 = arith.constant 0 : index
    %c0_73 = arith.constant 0 : index
    %63 = vector.load %arg6[%c1_71, %c0_72, %c0_73] : memref<4x128x50xf32, #tpu.memory_space<vmem>>, vector<1x128x50xf32>
    %64 = vector.shape_cast %63 : vector<1x128x50xf32> to vector<128x50xf32>
    %cst_74 = arith.constant dense<0.000000e+00> : vector<2x50xf32>
    %65 = tpu.matmul %62, %64, %cst_74 {dimension_numbers = #tpu.dot_dimension_numbers<[1], [0], [0], [1], [0, 0, 1, 1], [], []>} : vector<2x128xf32>, vector<128x50xf32>, vector<2x50xf32> -> vector<2x50xf32>
    %66 = arith.addf %53, %65 : vector<2x50xf32>
    %c0_75 = arith.constant 0 : index
    %c4_76 = arith.constant 4 : index
    %c0_77 = arith.constant 0 : index
    %67 = vector.load %arg13[%c0_75, %c4_76, %c0_77] : memref<2x8x128xf32, #tpu.memory_space<vmem>>, vector<2x1x128xf32>
    %c0_78 = arith.constant 0 : index
    %c5 = arith.constant 5 : index
    %c0_79 = arith.constant 0 : index
    %68 = vector.load %arg13[%c0_78, %c5, %c0_79] : memref<2x8x128xf32, #tpu.memory_space<vmem>>, vector<2x1x128xf32>
    %69 = arith.maximumf %67, %68 : vector<2x1x128xf32>
    %70 = vector.shape_cast %69 : vector<2x1x128xf32> to vector<2x128xf32>
    %c0_80 = arith.constant 0 : index
    %c0_81 = arith.constant 0 : index
    %71 = vector.load %arg5[%c0_80, %c0_81] : memref<1x128xf32, #tpu.memory_space<vmem>>, vector<1x128xf32>
    %72 = vector.broadcast %71 : vector<1x128xf32> to vector<2x128xf32>
    %73 = arith.addf %70, %72 : vector<2x128xf32>
    %cst_82 = arith.constant 0.000000e+00 : f32
    %74 = vector.broadcast %cst_82 : f32 to vector<2x128xf32>
    %75 = arith.maximumf %73, %74 : vector<2x128xf32>
    %c2_83 = arith.constant 2 : index
    %c0_84 = arith.constant 0 : index
    %c0_85 = arith.constant 0 : index
    %76 = vector.load %arg6[%c2_83, %c0_84, %c0_85] : memref<4x128x50xf32, #tpu.memory_space<vmem>>, vector<1x128x50xf32>
    %77 = vector.shape_cast %76 : vector<1x128x50xf32> to vector<128x50xf32>
    %cst_86 = arith.constant dense<0.000000e+00> : vector<2x50xf32>
    %78 = tpu.matmul %75, %77, %cst_86 {dimension_numbers = #tpu.dot_dimension_numbers<[1], [0], [0], [1], [0, 0, 1, 1], [], []>} : vector<2x128xf32>, vector<128x50xf32>, vector<2x50xf32> -> vector<2x50xf32>
    %79 = arith.addf %66, %78 : vector<2x50xf32>
    %c0_87 = arith.constant 0 : index
    %c6 = arith.constant 6 : index
    %c0_88 = arith.constant 0 : index
    %80 = vector.load %arg13[%c0_87, %c6, %c0_88] : memref<2x8x128xf32, #tpu.memory_space<vmem>>, vector<2x1x128xf32>
    %c0_89 = arith.constant 0 : index
    %c7 = arith.constant 7 : index
    %c0_90 = arith.constant 0 : index
    %81 = vector.load %arg13[%c0_89, %c7, %c0_90] : memref<2x8x128xf32, #tpu.memory_space<vmem>>, vector<2x1x128xf32>
    %82 = arith.maximumf %80, %81 : vector<2x1x128xf32>
    %83 = vector.shape_cast %82 : vector<2x1x128xf32> to vector<2x128xf32>
    %c0_91 = arith.constant 0 : index
    %c0_92 = arith.constant 0 : index
    %84 = vector.load %arg5[%c0_91, %c0_92] : memref<1x128xf32, #tpu.memory_space<vmem>>, vector<1x128xf32>
    %85 = vector.broadcast %84 : vector<1x128xf32> to vector<2x128xf32>
    %86 = arith.addf %83, %85 : vector<2x128xf32>
    %cst_93 = arith.constant 0.000000e+00 : f32
    %87 = vector.broadcast %cst_93 : f32 to vector<2x128xf32>
    %88 = arith.maximumf %86, %87 : vector<2x128xf32>
    %c3_94 = arith.constant 3 : index
    %c0_95 = arith.constant 0 : index
    %c0_96 = arith.constant 0 : index
    %89 = vector.load %arg6[%c3_94, %c0_95, %c0_96] : memref<4x128x50xf32, #tpu.memory_space<vmem>>, vector<1x128x50xf32>
    %90 = vector.shape_cast %89 : vector<1x128x50xf32> to vector<128x50xf32>
    %cst_97 = arith.constant dense<0.000000e+00> : vector<2x50xf32>
    %91 = tpu.matmul %88, %90, %cst_97 {dimension_numbers = #tpu.dot_dimension_numbers<[1], [0], [0], [1], [0, 0, 1, 1], [], []>} : vector<2x128xf32>, vector<128x50xf32>, vector<2x50xf32> -> vector<2x50xf32>
    %92 = arith.addf %79, %91 : vector<2x50xf32>
    %c0_98 = arith.constant 0 : index
    %c0_99 = arith.constant 0 : index
    %93 = vector.load %arg7[%c0_98, %c0_99] : memref<1x50xf32, #tpu.memory_space<vmem>>, vector<1x50xf32>
    %94 = vector.broadcast %93 : vector<1x50xf32> to vector<2x50xf32>
    %95 = arith.addf %92, %94 : vector<2x50xf32>
    %cst_100 = arith.constant 0.000000e+00 : f32
    %96 = vector.broadcast %cst_100 : f32 to vector<2x50xf32>
    %97 = arith.maximumf %95, %96 : vector<2x50xf32>
    %c0_101 = arith.constant 0 : index
    %c0_102 = arith.constant 0 : index
    %98 = vector.load %arg8[%c0_101, %c0_102] : memref<50x10xf32, #tpu.memory_space<vmem>>, vector<50x10xf32>
    %cst_103 = arith.constant dense<0.000000e+00> : vector<2x10xf32>
    %99 = tpu.matmul %97, %98, %cst_103 {dimension_numbers = #tpu.dot_dimension_numbers<[1], [0], [0], [1], [0, 0, 1, 1], [], []>} : vector<2x50xf32>, vector<50x10xf32>, vector<2x10xf32> -> vector<2x10xf32>
    %c0_104 = arith.constant 0 : index
    %c0_105 = arith.constant 0 : index
    %100 = vector.load %arg9[%c0_104, %c0_105] : memref<1x10xf32, #tpu.memory_space<vmem>>, vector<1x10xf32>
    %101 = vector.broadcast %100 : vector<1x10xf32> to vector<2x10xf32>
    %102 = arith.addf %99, %101 : vector<2x10xf32>
    %cst_106 = arith.constant dense<0xFF800000> : vector<2xf32>
    %103 = vector.multi_reduction <maximumf>, %102, %cst_106 [1] : vector<2x10xf32> to vector<2xf32>
    %104 = vector.shape_cast %103 : vector<2xf32> to vector<2x1xf32>
    %105 = vector.broadcast %104 : vector<2x1xf32> to vector<2x10xf32>
    %106 = arith.subf %102, %105 : vector<2x10xf32>
    %107 = math.exp %106 : vector<2x10xf32>
    %cst_107 = arith.constant dense<0.000000e+00> : vector<2xf32>
    %108 = vector.multi_reduction <add>, %107, %cst_107 [1] : vector<2x10xf32> to vector<2xf32>
    %109 = vector.shape_cast %108 : vector<2xf32> to vector<2x1xf32>
    %110 = math.log %109 : vector<2x1xf32>
    %111 = vector.broadcast %104 : vector<2x1xf32> to vector<2x10xf32>
    %112 = arith.subf %102, %111 : vector<2x10xf32>
    %113 = vector.broadcast %110 : vector<2x1xf32> to vector<2x10xf32>
    %114 = arith.subf %112, %113 : vector<2x10xf32>
    %c0_108 = arith.constant 0 : index
    %c0_109 = arith.constant 0 : index
    %115 = vector.load %arg10[%c0_108, %c0_109] : memref<2x10xf32, #tpu.memory_space<vmem>>, vector<2x10xf32>
    tpu.vector_store %arg10[%c0_108, %c0_109], %114 {strides = array<i32>} : memref<2x10xf32, #tpu.memory_space<vmem>>, vector<2x10xf32>,
    return
  }
  func.func @transform_0(%arg0: i32) -> (i32, i32, i32) {
    %c0_i32 = arith.constant 0 : i32
    %c0_i32_0 = arith.constant 0 : i32
    %c0_i32_1 = arith.constant 0 : i32
    return %arg0, %c0_i32, %c0_i32_0 : i32, i32, i32
  }
  func.func @transform_1(%arg0: i32) -> (i32, i32) {
    %c0_i32 = arith.constant 0 : i32
    %c0_i32_0 = arith.constant 0 : i32
    %c0_i32_1 = arith.constant 0 : i32
    return %c0_i32, %c0_i32_0 : i32, i32
  }
  func.func @transform_2(%arg0: i32) -> (i32, i32) {
    %c0_i32 = arith.constant 0 : i32
    %c0_i32_0 = arith.constant 0 : i32
    %c0_i32_1 = arith.constant 0 : i32
    return %c0_i32, %c0_i32_0 : i32, i32
  }
  func.func @transform_3(%arg0: i32) -> (i32, i32) {
    %c0_i32 = arith.constant 0 : i32
    %c0_i32_0 = arith.constant 0 : i32
    %c0_i32_1 = arith.constant 0 : i32
    return %c0_i32, %c0_i32_0 : i32, i32
  }
  func.func @transform_4(%arg0: i32) -> (i32, i32) {
    %c0_i32 = arith.constant 0 : i32
    %c0_i32_0 = arith.constant 0 : i32
    %c0_i32_1 = arith.constant 0 : i32
    return %c0_i32, %c0_i32_0 : i32, i32
  }
  func.func @transform_5(%arg0: i32) -> (i32, i32, i32) {
    %c0_i32 = arith.constant 0 : i32
    %c0_i32_0 = arith.constant 0 : i32
    %c0_i32_1 = arith.constant 0 : i32
    %c0_i32_2 = arith.constant 0 : i32
    return %c0_i32, %c0_i32_0, %c0_i32_1 : i32, i32, i32
  }
  func.func @transform_6(%arg0: i32) -> (i32, i32) {
    %c0_i32 = arith.constant 0 : i32
    %c0_i32_0 = arith.constant 0 : i32
    %c0_i32_1 = arith.constant 0 : i32
    return %c0_i32, %c0_i32_0 : i32, i32
  }
  func.func @transform_7(%arg0: i32) -> (i32, i32) {
    %c0_i32 = arith.constant 0 : i32
    %c0_i32_0 = arith.constant 0 : i32
    %c0_i32_1 = arith.constant 0 : i32
    return %c0_i32, %c0_i32_0 : i32, i32
  }
  func.func @transform_8(%arg0: i32) -> (i32, i32) {
    %c0_i32 = arith.constant 0 : i32
    %c0_i32_0 = arith.constant 0 : i32
    %c0_i32_1 = arith.constant 0 : i32
    return %c0_i32, %c0_i32_0 : i32, i32
  }
  func.func @transform_9(%arg0: i32) -> (i32, i32) {
    %c0_i32 = arith.constant 0 : i32
    %c0_i32_0 = arith.constant 0 : i32
    return %arg0, %c0_i32 : i32, i32
  }
}

</mosaic_0001>

<bundles_post_ra>
// kernel: smallnet_forward.1
= control target key start
LH: loop header
LB: loop body
LE: loop exit
PB: predicated region body
PF: predicated region fallthrough
CT: control target
= control target key end

     0   :  { %s2350_s25 = smov 28   ;;  %s2351_s26 = smov 84   ;;  %vm310_vm0 = vcmask 1045504   ;;  %s3138_s0 = inlined_call_operand.vmem [shape: f32[2,28,28], index: 0, kind: input, shape index: {}]   ;;  %s3139_s1 = inlined_call_operand.vmem [shape: bf16[140,256], index: 1, kind: input, shape index: {}]   ;;  %s3140_s2 = inlined_call_operand.vmem [shape: f32[1,128], index: 2, kind: input, shape index: {}]   ;;  %s3141_s3 = inlined_call_operand.vmem [shape: bf16[640,256], index: 3, kind: input, shape index: {}]   ;;  %s3142_s4 = inlined_call_operand.vmem [shape: f32[1,128], index: 4, kind: input, shape index: {}]   ;;  %s3143_s5 = inlined_call_operand.vmem [shape: f32[4,128,50], index: 5, kind: input, shape index: {}]   ;;  %s3144_s6 = inlined_call_operand.vmem [shape: f32[1,50], index: 6, kind: input, shape index: {}]   ;;  %s3145_s7 = inlined_call_operand.vmem [shape: f32[50,10], index: 7, kind: input, shape index: {}]   ;;  %s3146_s8 = inlined_call_operand.vmem [shape: f32[1,10], index: 8, kind: input, shape index: {}]   ;;  %s3147_s9 = inlined_call_operand.hbm [shape: f32[2,10], index: 9, kind: output, shape index: {}]  }
   0x1   :  { %v40_v0 = vld [vmem:[%s3138_s0 + $0x1] sm:$0xff]  ;;  %v41_v1 = vld [vmem:[%s3138_s0 + $0x9] sm:$0xff]  ;;  %v42_v12 = vld [vmem:[%s3138_s0 + $0x11] sm:$0xff]  ;;  %s2352_s16 = smov 56   ;;  %s2353_s23 = smov 112  }
   0x2   :  { %v52_v2 = vld [vmem:[%s3138_s0 + $0x3] sm:$0xff]  ;;  %v2115_v3 = vpack.i.bf16 %v41_v1, %v40_v0  ;;  %v53_v4 = vld [vmem:[%s3138_s0 + $0xb] sm:$0xff]  ;;  %v54_v16 = vld [vmem:[%s3138_s0 + $0x13] sm:$0xff] }
   0x3   :  { %v46_v5 = vld [vmem:[%s3138_s0 + $0x2] sm:$0xff]  ;;  %v47_v6 = vld [vmem:[%s3138_s0 + $0xa] sm:$0xff]  ;;  %v2125_v7 = vpack.i.bf16 %v53_v4, %v52_v2  ;;  %v48_v14 = vld [vmem:[%s3138_s0 + $0x12] sm:$0xff] }
   0x4   :  { %v58_v8 = vld [vmem:[%s3138_s0 + $0x4] sm:$0xff]  ;;  %v59_v9 = vld [vmem:[%s3138_s0 + $0xc] sm:$0xff]  ;;  %2116 = vrot.lane.b32.xlu0 %v2115_v3, %s2350_s25  ;;  %v2120_v10 = vpack.i.bf16 %v47_v6, %v46_v5  ;;  %v60_v19 = vld [vmem:[%s3138_s0 + $0x14] sm:$0xff] }
   0x5   :  { %2126 = vrot.lane.b32.xlu1 %v2125_v7, %s2351_s26  ;;  %v2130_v11 = vpack.i.bf16 %v59_v9, %v58_v8  ;;  %v43_v13 = vld [vmem:[%s3138_s0 + $0x21] sm:$0xff]  ;;  %v44_v24 = vld [vmem:[%s3138_s0 + $0x29] sm:$0xff]  ;;  %v45_v25 = vld [vmem:[%s3138_s0 + $0x31] sm:$0xff] }
   0x6   :  { %v49_v15 = vld [vmem:[%s3138_s0 + $0x22] sm:$0xff]  ;;  %v2135_v17 = vpack.i.bf16 %v43_v13, %v42_v12  ;;  %v2178_v26 = vld [vmem:[%s3139_s1 + $0x14] ss:$8 sps:$4 sm:$0xff]   ;;  %v50_v28 = vld [vmem:[%s3138_s0 + $0x2a] sm:$0xff]  ;;  %v2155_v34 = vpack.i.bf16 %v45_v25, %v44_v24 }
   0x7   :  { %v55_v18 = vld [vmem:[%s3138_s0 + $0x23] sm:$0xff]  ;;  %v2140_v21 = vpack.i.bf16 %v49_v15, %v48_v14  ;;  %v2180_v29 = vld [vmem:[%s3139_s1 + $0x10] ss:$8 sps:$4 sm:$0xff]   ;;  %v2184_v38 = vld [vmem:[%s3139_s1 + $0x34] ss:$8 sps:$4 sm:$0xff]  }
   0x8   :  { %2121 = vrot.lane.b32.xlu0 %v2120_v10, %s2352_s16  ;;  %v61_v20 = vld [vmem:[%s3138_s0 + $0x24] sm:$0xff]  ;;  %v2145_v27 = vpack.i.bf16 %v55_v18, %v54_v16  ;;  %v51_v32 = vld [vmem:[%s3138_s0 + $0x32] sm:$0xff] }
   0x9   :  { %2131 = vrot.lane.b32.xlu1 %v2130_v11, %s2353_s23  ;;  %v2175_v22 = vld [vmem:[%s3139_s1 + $0x4] ss:$8 sps:$4 sm:$0xff]   ;;  %v2177_v23 = vld [vmem:[%s3139_s1] ss:$8 sps:$4 sm:$0xff]   ;;  %v2150_v30 = vpack.i.bf16 %v61_v20, %v60_v19  ;;  %v57_v35 = vld [vmem:[%s3138_s0 + $0x33] sm:$0xff]  ;;  %v2160_v37 = vpack.i.bf16 %v51_v32, %v50_v28 }
   0xa   :  { %317 = vmatprep.subr.bf16.mxu0 %v2175_v22  ;;  %v2181_v31 = vld [vmem:[%s3139_s1 + $0x24] ss:$8 sps:$4 sm:$0xff]   ;;  %v2183_v36 = vld [vmem:[%s3139_s1 + $0x20] ss:$8 sps:$4 sm:$0xff]   ;;  %v63_v40 = vld [vmem:[%s3138_s0 + $0x34] sm:$0xff] }
   0xb   :  { %318 = vmatpush1.bf16.msra.mxu0 %v2177_v23  ;;  %v56_v33 = vld [vmem:[%s3138_s0 + $0x2b] sm:$0xff]  ;;  %v2190_v48 = vld [vmem:[%s3139_s1 + $0x54] ss:$8 sps:$4 sm:$0xff]   ;;  %v2201_v62 = vld [vmem:[%s3139_s1 + $0x80] ss:$8 sps:$4 sm:$0x3f]  }
   0xc   :  { %2136 = vrot.lane.b32.xlu0 %v2135_v17, %s2350_s25  ;;  %319 = vmatprep.subr.bf16.mxu0 %v2178_v26  ;;  %v62_v39 = vld [vmem:[%s3138_s0 + $0x2c] sm:$0xff]  ;;  %v2165_v41 = vpack.i.bf16 %v57_v35, %v56_v33  ;;  %v2189_v45 = vld [vmem:[%s3139_s1 + $0x40] ss:$8 sps:$4 sm:$0xff]   ;;  %v2205_v49 = vld [vmem:[%s3141_s3 + $0x14] ss:$8 sps:$4 sm:$0xff]   ;;  %v312_v0 = vsel %vm310_vm0, %v2201_v62, 0 }
   0xd   :  { %2141 = vrot.lane.b32.xlu1 %v2140_v21, %s2352_s16  ;;  %v2186_v42 = vld [vmem:[%s3139_s1 + $0x30] ss:$8 sps:$4 sm:$0xff]   ;;  %v2170_v43 = vpack.i.bf16 %v63_v40, %v62_v39  ;;  %v2187_v44 = vld [vmem:[%s3139_s1 + $0x44] ss:$8 sps:$4 sm:$0xff]   ;;  %v2204_v47 = vld [vmem:[%s3141_s3] ss:$8 sps:$4 sm:$0xff]  }
   0xe   :  { %v2202_v46 = vld [vmem:[%s3141_s3 + $0x4] ss:$8 sps:$4 sm:$0xff]   ;;  %v2192_v50 = vld [vmem:[%s3139_s1 + $0x50] ss:$8 sps:$4 sm:$0xff]   ;;  %v2210_v54 = vld [vmem:[%s3141_s3 + $0x20] ss:$8 sps:$4 sm:$0xff]  }
   0xf   :  { %320 = vmatpush1.bf16.msra.mxu0 %v2180_v29  ;;  %925 = vmatprep.subr.bf16.mxu1 %v2202_v46  ;;  %v2207_v51 = vld [vmem:[%s3141_s3 + $0x10] ss:$8 sps:$4 sm:$0xff]   ;;  %v2208_v52 = vld [vmem:[%s3141_s3 + $0x24] ss:$8 sps:$4 sm:$0xff]   ;;  %v2195_v55 = vld [vmem:[%s3139_s1 + $0x60] ss:$8 sps:$4 sm:$0xff]  }
  0x10   :  { %2146 = vrot.lane.b32.xlu0 %v2145_v27, %s2351_s26  ;;  %321 = vmatprep.subr.bf16.mxu0 %v2181_v31  ;;  %v2193_v53 = vld [vmem:[%s3139_s1 + $0x64] ss:$8 sps:$4 sm:$0xff]   ;;  %v2211_v56 = vld [vmem:[%s3141_s3 + $0x34] ss:$8 sps:$4 sm:$0xff]   ;;  %v2213_v58 = vld [vmem:[%s3141_s3 + $0x30] ss:$8 sps:$4 sm:$0xff]  }
  0x11   :  { %2151 = vrot.lane.b32.xlu1 %v2150_v30, %s2353_s23  ;;  %926 = vmatpush1.bf16.msra.mxu1 %v2204_v47  ;;  %v2196_v57 = vld [vmem:[%s3139_s1 + $0x74] ss:$8 sps:$4 sm:$0xff]   ;;  %v2198_v59 = vld [vmem:[%s3139_s1 + $0x70] ss:$8 sps:$4 sm:$0xff]   ;;  %v2214_v60 = vld [vmem:[%s3141_s3 + $0x44] ss:$8 sps:$4 sm:$0xff]  }
  0x12   :  { %927 = vmatprep.subr.bf16.mxu1 %v2205_v49  ;;  %v2199_v61 = vld [vmem:[%s3139_s1 + $0x84] ss:$8 sps:$4 sm:$0x3f]   ;;  %v2216_v63 = vld [vmem:[%s3141_s3 + $0x40] ss:$8 sps:$4 sm:$0xff]  }
  0x13   :  { %322 = vmatpush1.bf16.msra.mxu0 %v2183_v36 }
  0x14   :  { %2156 = vrot.lane.b32.xlu0 %v2155_v34, %s2350_s25  ;;  %323 = vmatprep.subr.bf16.mxu0 %v2184_v38 }
  0x15   :  { %2161 = vrot.lane.b32.xlu1 %v2160_v37, %s2352_s16  ;;  %928 = vmatpush1.bf16.msra.mxu1 %v2207_v51 }
  0x16   :  { %929 = vmatprep.subr.bf16.mxu1 %v2208_v52 }
  0x17   :  { %324 = vmatpush1.bf16.msra.mxu0 %v2186_v42 }
  0x18   :  { %2166 = vrot.lane.b32.xlu0 %v2165_v41, %s2351_s26  ;;  %325 = vmatprep.subr.bf16.mxu0 %v2187_v44 }
  0x19   :  { %2171 = vrot.lane.b32.xlu1 %v2170_v43, %s2353_s23  ;;  %930 = vmatpush1.bf16.msra.mxu1 %v2210_v54 }
  0x1a   :  { %931 = vmatprep.subr.bf16.mxu1 %v2211_v56 }
  0x1b   :  { %326 = vmatpush1.bf16.msra.mxu0 %v2189_v45 }
  0x1c   :  { %327 = vmatprep.subr.bf16.mxu0 %v2190_v48 }
  0x1d   :  { %932 = vmatpush1.bf16.msra.mxu1 %v2213_v58 }
  0x1e   :  { %933 = vmatprep.subr.bf16.mxu1 %v2214_v60 }
  0x1f   :  { %328 = vmatpush1.bf16.msra.mxu0 %v2192_v50 }
  0x20   :  { %329 = vmatprep.subr.bf16.mxu0 %v2193_v53 }
  0x21   :  { %934 = vmatpush1.bf16.msra.mxu1 %v2216_v63 }
  0x23   :  { %330 = vmatpush1.bf16.msra.mxu0 %v2195_v55 }
  0x24   :  { %331 = vmatprep.subr.bf16.mxu0 %v2196_v57 }
  0x27   :  { %332 = vmatpush1.bf16.msra.mxu0 %v2198_v59 }
  0x28   :  { %1622 = vmatprep.subr.msk.bf16.mxu0 %vm310_vm0, %v2199_v61 }
  0x2b   :  { %334 = vmatpush1.bf16.msra.mxu0 %v312_v0 }
  0x2c   :  { %14 = vsyncpa [#allocation6], 0  ;;  %vm160_vm1 = vcmask 228352   ;;  %v34_v5 = vld [vmem:[%s3138_s0] sm:$0xff]  ;;  %v35_v6 = vld [vmem:[%s3138_s0 + $0x8] sm:$0xff]  ;;  %vm167_vm2 = vcmask 457728  }
  0x2d   :  { %vm174_vm3 = vcmask 687104   ;;  %vm181_vm4 = vcmask 916480   ;;  %vm300_vm5 = vcmask 97280   ;;  %v36_v20 = vld [vmem:[%s3138_s0 + $0x10] sm:$0xff]  ;;  %v37_v21 = vld [vmem:[%s3138_s0 + $0x20] sm:$0xff]  ;;  %v38_v47 = vld [vmem:[%s3138_s0 + $0x28] sm:$0xff] }
  0x2e   :  { %v39_v48 = vld [vmem:[%s3138_s0 + $0x30] sm:$0xff]  ;;  %vm2356_vm6 = vmmov 0   ;;  %vm1121_vm7 = vcmask 1041409   ;;  %vm1502_vm8 = vcmask 1041408   ;;  %vm1498_vm9 = vcmask 408576  }
  0x2f   :  { %vm1576_vm10 = vcmask 74752  }
  0x76   :  { %v2117_v1 = vpop.permute.xlu0 %2116 }
  0x77   :  { %v2127_v2 = vpop.permute.xlu1 %2126  ;;  %v2119_v3 = vunpack.i.h.bf16 %v2117_v1  ;;  %v2118_v4 = vunpack.i.l.bf16 %v2117_v1 }
  0x78   :  { %v2129_v8 = vunpack.i.h.bf16 %v2127_v2  ;;  %v2128_v9 = vunpack.i.l.bf16 %v2127_v2 }
  0x79   :  { %v161_v13 = vsel %vm160_vm1, %v34_v5, %v2118_v4  ;;  %v162_v14 = vsel %vm160_vm1, %v35_v6, %v2119_v3 }
  0x7a   :  { %v2122_v7 = vpop.permute.xlu0 %2121 }
  0x7b   :  { %v2124_v10 = vunpack.i.h.bf16 %v2122_v7  ;;  %v2123_v11 = vunpack.i.l.bf16 %v2122_v7  ;;  %v2132_v12 = vpop.permute.xlu1 %2131 }
  0x7c   :  { %v2134_v15 = vunpack.i.h.bf16 %v2132_v12  ;;  %v2133_v16 = vunpack.i.l.bf16 %v2132_v12  ;;  %v2222_v12 = vld [vmem:[%s3141_s3 + $0x60] ss:$8 sps:$4 sm:$0xff]  }
  0x7d   :  { %v168_v17 = vsel %vm167_vm2, %v161_v13, %v2123_v11  ;;  %v169_v18 = vsel %vm167_vm2, %v162_v14, %v2124_v10  ;;  %v2219_v10 = vld [vmem:[%s3141_s3 + $0x50] ss:$8 sps:$4 sm:$0xff]   ;;  %v2220_v11 = vld [vmem:[%s3141_s3 + $0x64] ss:$8 sps:$4 sm:$0xff]   ;;  %v2223_v13 = vld [vmem:[%s3141_s3 + $0x74] ss:$8 sps:$4 sm:$0xff]  }
  0x7e   :  { %v2137_v19 = vpop.permute.xlu0 %2136  ;;  %v189_v22 = vpack.c.bf16 %v2134_v15, %v2133_v16  ;;  %v175_v23 = vsel %vm174_vm3, %v168_v17, %v2128_v9  ;;  %v176_v24 = vsel %vm174_vm3, %v169_v18, %v2129_v8  ;;  %v2217_v9 = vld [vmem:[%s3141_s3 + $0x54] ss:$8 sps:$4 sm:$0xff]   ;;  %v2225_v14 = vld [vmem:[%s3141_s3 + $0x70] ss:$8 sps:$4 sm:$0xff]  }
  0x7f   :  { %v2139_v25 = vunpack.i.h.bf16 %v2137_v19  ;;  %v2138_v26 = vunpack.i.l.bf16 %v2137_v19  ;;  %v2142_v27 = vpop.permute.xlu1 %2141  ;;  %v182_v28 = vsel %vm181_vm4, %v175_v23, %v2133_v16  ;;  %v183_v29 = vsel %vm181_vm4, %v176_v24, %v2134_v15  ;;  %935 = vmatprep.subr.bf16.mxu1 %v2217_v9  ;;  %v2226_v15 = vld [vmem:[%s3141_s3 + $0x84] ss:$8 sps:$4 sm:$0xff]   ;;  %v2228_v16 = vld [vmem:[%s3141_s3 + $0x80] ss:$8 sps:$4 sm:$0xff]   ;;  %v2229_v17 = vld [vmem:[%s3141_s3 + $0x94] ss:$8 sps:$4 sm:$0xff]  }
  0x80   :  { %v2144_v30 = vunpack.i.h.bf16 %v2142_v27  ;;  %v2143_v31 = vunpack.i.l.bf16 %v2142_v27  ;;  %1623 = vmatprep.mubr.msk.bf16.mxu0 %vm300_vm5, %v189_v22  ;;  %v188_v32 = vpack.c.bf16 %v183_v29, %v182_v28  ;;  %936 = vmatpush1.bf16.msra.mxu1 %v2219_v10  ;;  %v2231_v18 = vld [vmem:[%s3141_s3 + $0x90] ss:$8 sps:$4 sm:$0xff]   ;;  %v2232_v19 = vld [vmem:[%s3141_s3 + $0xa4] ss:$8 sps:$4 sm:$0xff]   ;;  %v2240_v24 = vld [vmem:[%s3141_s3 + $0xc0] ss:$8 sps:$4 sm:$0xff]  }
  0x81   :  { %v163_v33 = vsel %vm160_vm1, %v36_v20, %v2138_v26  ;;  %v164_v34 = vsel %vm160_vm1, %v37_v21, %v2139_v25  ;;  %937 = vmatprep.subr.bf16.mxu1 %v2220_v11  ;;  %v2234_v20 = vld [vmem:[%s3141_s3 + $0xa0] ss:$8 sps:$4 sm:$0xff]   ;;  %v2235_v21 = vld [vmem:[%s3141_s3 + $0xb4] ss:$8 sps:$4 sm:$0xff]   ;;  %v2237_v22 = vld [vmem:[%s3141_s3 + $0xb0] ss:$8 sps:$4 sm:$0xff]  }
  0x82   :  { %v170_v35 = vsel %vm167_vm2, %v163_v33, %v2143_v31  ;;  %v171_v36 = vsel %vm167_vm2, %v164_v34, %v2144_v30  ;;  %v2147_v37 = vpop.permute.xlu0 %2146  ;;  %350 = vmatmul.mubr.bf16.vlgmr.msra.gmra.mrb[0].mxu0 %v188_v32  ;;  %v2238_v23 = vld [vmem:[%s3141_s3 + $0xc4] ss:$8 sps:$4 sm:$0xff]   ;;  %v2241_v25 = vld [vmem:[%s3141_s3 + $0xd4] ss:$8 sps:$4 sm:$0xff]   ;;  %v2243_v26 = vld [vmem:[%s3141_s3 + $0xd0] ss:$8 sps:$4 sm:$0xff]  }
  0x83   :  { %v2149_v38 = vunpack.i.h.bf16 %v2147_v37  ;;  %v2148_v39 = vunpack.i.l.bf16 %v2147_v37  ;;  %v2152_v40 = vpop.permute.xlu1 %2151  ;;  %v2244_v27 = vld [vmem:[%s3141_s3 + $0xe4] ss:$8 sps:$4 sm:$0xff]   ;;  %v2246_v28 = vld [vmem:[%s3141_s3 + $0xe0] ss:$8 sps:$4 sm:$0xff]   ;;  %v2247_v29 = vld [vmem:[%s3141_s3 + $0xf4] ss:$8 sps:$4 sm:$0xff]  }
  0x84   :  { %v2154_v41 = vunpack.i.h.bf16 %v2152_v40  ;;  %v2153_v42 = vunpack.i.l.bf16 %v2152_v40  ;;  %938 = vmatpush1.bf16.msra.mxu1 %v2222_v12  ;;  %v2249_v30 = vld [vmem:[%s3141_s3 + $0xf0] ss:$8 sps:$4 sm:$0xff]   ;;  %v2252_v31 = vld [vmem:[%s3141_s3 + $0x104] ss:$8 sps:$4 sm:$0xff]  }
  0x85   :  { %v177_v43 = vsel %vm174_vm3, %v170_v35, %v2148_v39  ;;  %v178_v44 = vsel %vm174_vm3, %v171_v36, %v2149_v38  ;;  %939 = vmatprep.subr.bf16.mxu1 %v2223_v13 }
  0x86   :  { %v191_v45 = vpack.c.bf16 %v2154_v41, %v2153_v42  ;;  %v2157_v46 = vpop.permute.xlu0 %2156  ;;  %v184_v49 = vsel %vm181_vm4, %v177_v43, %v2153_v42  ;;  %v185_v50 = vsel %vm181_vm4, %v178_v44, %v2154_v41 }
  0x87   :  { %v2159_v51 = vunpack.i.h.bf16 %v2157_v46  ;;  %v2158_v52 = vunpack.i.l.bf16 %v2157_v46  ;;  %v2162_v53 = vpop.permute.xlu1 %2161  ;;  %v190_v54 = vpack.c.bf16 %v185_v50, %v184_v49  ;;  %v1626_v46 = vld [vmem:[%s3140_s2] ss:$0 sm:$0xff] }
  0x88   :  { %v2164_v55 = vunpack.i.h.bf16 %v2162_v53  ;;  %v2163_v56 = vunpack.i.l.bf16 %v2162_v53  ;;  %1624 = vmatprep.mubr.msk.bf16.mxu0 %vm300_vm5, %v191_v45  ;;  %940 = vmatpush1.bf16.msra.mxu1 %v2225_v14  ;;  %v1708_v50 = vld [vmem:[%s3143_s5 + $0x80] sm:$0xff] }
  0x89   :  { %v165_v57 = vsel %vm160_vm1, %v38_v47, %v2158_v52  ;;  %v166_v58 = vsel %vm160_vm1, %v39_v48, %v2159_v51  ;;  %941 = vmatprep.subr.bf16.mxu1 %v2226_v15  ;;  %v1709_v51 = vld [vmem:[%s3143_s5 + $0x88] sm:$0xff]  ;;  %v1710_v52 = vld [vmem:[%s3143_s5 + $0x90] sm:$0xff] }
  0x8a   :  { %v172_v59 = vsel %vm167_vm2, %v165_v57, %v2163_v56  ;;  %v173_v60 = vsel %vm167_vm2, %v166_v58, %v2164_v55  ;;  %v2167_v61 = vpop.permute.xlu0 %2166  ;;  %360 = vmatmul.mubr.bf16.gmra.mrb[4].mxu0 %v190_v54  ;;  %v2354_v54 = vmov 0.0|0.0   ;;  %v1994_v55 = vpack.c.bf16 %v1709_v51, %v1708_v50  ;;  %v1711_v56 = vld [vmem:[%s3143_s5 + $0x98] sm:$0xff]  ;;  %v2294_v51 = vld [vmem:[%s3141_s3 + $0x1e4] ss:$8 sps:$4 sm:$0xff]  }
  0x8b   :  { %v2169_v62 = vunpack.i.h.bf16 %v2167_v61  ;;  %v2168_v63 = vunpack.i.l.bf16 %v2167_v61  ;;  %v2172_v0 = vpop.permute.xlu1 %2171  ;;  %1993 = vmatprep.subr.bf16.mxu0 %v2354_v54  ;;  %v2289_v50 = vld [vmem:[%s3141_s3 + $0x1d0] ss:$8 sps:$4 sm:$0xff]  }
  0x8c   :  { %v2174_v1 = vunpack.i.h.bf16 %v2172_v0  ;;  %v2173_v2 = vunpack.i.l.bf16 %v2172_v0  ;;  %942 = vmatpush1.bf16.msra.mxu1 %v2228_v16  ;;  %1995 = vmatpush3.bf16.msra.mxu0 %v1994_v55  ;;  %v2295_v55 = vld [vmem:[%s3141_s3 + $0x1f0] ss:$8 sps:$4 sm:$0xff]  }
  0x8d   :  { %v179_v3 = vsel %vm174_vm3, %v172_v59, %v2168_v63  ;;  %v180_v4 = vsel %vm174_vm3, %v173_v60, %v2169_v62  ;;  %943 = vmatprep.subr.bf16.mxu1 %v2229_v17  ;;  %v1997_v62 = vpack.c.bf16 %v1711_v56, %v1710_v52  ;;  %1996 = vmatprep.subr.bf16.mxu0 %v2354_v54  ;;  %v2292_v52 = vld [vmem:[%s3141_s3 + $0x1e0] ss:$8 sps:$4 sm:$0xff]   ;;  %v2300_v56 = vld [vmem:[%s3141_s3 + $0x204] ss:$8 sps:$4 sm:$0xff]  }
  0x8e   :  { %v193_v5 = vpack.c.bf16 %v2174_v1, %v2173_v2  ;;  %v186_v6 = vsel %vm181_vm4, %v179_v3, %v2173_v2  ;;  %v187_v7 = vsel %vm181_vm4, %v180_v4, %v2174_v1  ;;  %v1712_v1 = vld [vmem:[%s3143_s5 + $0xa0] sm:$0xff]  ;;  %v1713_v2 = vld [vmem:[%s3143_s5 + $0xa8] sm:$0xff] }
  0x8f   :  { %v192_v8 = vpack.c.bf16 %v187_v7, %v186_v6 }
  0x90   :  { %1625 = vmatprep.mubr.msk.bf16.mxu0 %vm300_vm5, %v193_v5  ;;  %944 = vmatpush1.bf16.msra.mxu1 %v2231_v18  ;;  %v2000_v5 = vpack.c.bf16 %v1713_v2, %v1712_v1  ;;  %v2304_v1 = vld [vmem:[%s3141_s3 + $0x220] ss:$8 sps:$4 sm:$0xff]   ;;  %v2309_v2 = vld [vmem:[%s3141_s3 + $0x234] ss:$8 sps:$4 sm:$0xff]  }
  0x91   :  { %945 = vmatprep.subr.bf16.mxu1 %v2232_v19  ;;  %1998 = vmatpush3.bf16.msra.mxu0 %v1997_v62  ;;  %v2301_v62 = vld [vmem:[%s3141_s3 + $0x210] ss:$8 sps:$4 sm:$0xff]  }
  0x92   :  { %370 = vmatmul.mubr.bf16.gmra.mrb[8].mxu0 %v192_v8  ;;  %1999 = vmatprep.subr.bf16.mxu0 %v2354_v54 }
  0x94   :  { %946 = vmatpush1.bf16.msra.mxu1 %v2234_v20 }
  0x95   :  { %947 = vmatprep.subr.bf16.mxu1 %v2235_v21  ;;  %2001 = vmatpush3.bf16.msra.mxu0 %v2000_v5  ;;  %v2250_v21 = vld [vmem:[%s3141_s3 + $0x100] ss:$8 sps:$4 sm:$0xff]  }
  0x96   :  { %2002 = vmatprep.subr.bf16.mxu0 %v2354_v54  ;;  %v2310_v5 = vld [vmem:[%s3141_s3 + $0x240] ss:$8 sps:$4 sm:$0xff]  }
  0x98   :  { %948 = vmatpush1.bf16.msra.mxu1 %v2237_v22 }
  0x99   :  { %949 = vmatprep.subr.bf16.mxu1 %v2238_v23 }
  0x9c   :  { %950 = vmatpush1.bf16.msra.mxu1 %v2240_v24  ;;  %v2255_v24 = vld [vmem:[%s3141_s3 + $0x114] ss:$8 sps:$4 sm:$0xff]  }
  0x9d   :  { %951 = vmatprep.subr.bf16.mxu1 %v2241_v25 }
  0xa0   :  { %952 = vmatpush1.bf16.msra.mxu1 %v2243_v26  ;;  %v2253_v26 = vld [vmem:[%s3141_s3 + $0x110] ss:$8 sps:$4 sm:$0xff]  }
  0xa1   :  { %953 = vmatprep.subr.bf16.mxu1 %v2244_v27  ;;  %v2258_v27 = vld [vmem:[%s3141_s3 + $0x124] ss:$8 sps:$4 sm:$0xff]  }
  0xa4   :  { %954 = vmatpush1.bf16.msra.mxu1 %v2246_v28  ;;  %v2256_v28 = vld [vmem:[%s3141_s3 + $0x120] ss:$8 sps:$4 sm:$0xff]  }
  0xa5   :  { %955 = vmatprep.subr.bf16.mxu1 %v2247_v29  ;;  %v2261_v29 = vld [vmem:[%s3141_s3 + $0x134] ss:$8 sps:$4 sm:$0xff]  }
  0xa8   :  { %956 = vmatpush1.bf16.msra.mxu1 %v2249_v30  ;;  %v2259_v30 = vld [vmem:[%s3141_s3 + $0x130] ss:$8 sps:$4 sm:$0xff]  }
  0xa9   :  { %968 = vmatprep.subr.bf16.mxu1 %v2252_v31  ;;  %v2264_v31 = vld [vmem:[%s3141_s3 + $0x144] ss:$8 sps:$4 sm:$0xff]  }
 0x155   :  { %v351_v32 = vpop.f32.mrb[0].mxu0 }
 0x156   :  { %v353_v33 = vpop.f32.mrb[1].mxu0 }
 0x157   :  { %v380_v34 = vmax.f32 %v351_v32, %v353_v33  ;;  %v355_v35 = vpop.f32.mrb[2].mxu0  ;;  %v2262_v32 = vld [vmem:[%s3141_s3 + $0x140] ss:$8 sps:$4 sm:$0xff]   ;;  %v2267_v33 = vld [vmem:[%s3141_s3 + $0x154] ss:$8 sps:$4 sm:$0xff]  }
 0x158   :  { %v357_v36 = vpop.f32.mrb[3].mxu0 }
 0x159   :  { %386 = vst [vmem:[#allocation2] sm:$0xff] %v380_v34  ;;  %v381_v37 = vmax.f32 %v355_v35, %v357_v36  ;;  %v2265_v34 = vld [vmem:[%s3141_s3 + $0x150] ss:$8 sps:$4 sm:$0xff]   ;;  %v2270_v35 = vld [vmem:[%s3141_s3 + $0x164] ss:$8 sps:$4 sm:$0xff]  }
 0x15a   :  { %v2268_v36 = vld [vmem:[%s3141_s3 + $0x160] ss:$8 sps:$4 sm:$0xff]  }
 0x15b   :  { %387 = vst [vmem:[#allocation2 + $0x8] sm:$0xff] %v381_v37  ;;  %v2273_v37 = vld [vmem:[%s3141_s3 + $0x174] ss:$8 sps:$4 sm:$0xff]  }
 0x15d   :  { %v361_v38 = vpop.f32.mrb[4].mxu0 }
 0x15e   :  { %v363_v39 = vpop.f32.mrb[5].mxu0 }
 0x15f   :  { %v382_v40 = vmax.f32 %v361_v38, %v363_v39  ;;  %v365_v41 = vpop.f32.mrb[6].mxu0  ;;  %v2271_v38 = vld [vmem:[%s3141_s3 + $0x170] ss:$8 sps:$4 sm:$0xff]   ;;  %v2276_v39 = vld [vmem:[%s3141_s3 + $0x184] ss:$8 sps:$4 sm:$0xff]  }
 0x160   :  { %v367_v42 = vpop.f32.mrb[7].mxu0 }
 0x161   :  { %388 = vst [vmem:[#allocation2 + $0x10] sm:$0xff] %v382_v40  ;;  %v383_v43 = vmax.f32 %v365_v41, %v367_v42  ;;  %v2274_v40 = vld [vmem:[%s3141_s3 + $0x180] ss:$8 sps:$4 sm:$0xff]   ;;  %v2279_v41 = vld [vmem:[%s3141_s3 + $0x194] ss:$8 sps:$4 sm:$0xff]  }
 0x162   :  { %v392_v44 = vld [vmem:[#allocation2] ss:$2 sm:$0xff]  ;;  %v400_v45 = vld [vmem:[#allocation2 + $0x1] ss:$2 sm:$0xff] }
 0x163   :  { %v407_v47 = vmax.f32 %v392_v44, %v400_v45  ;;  %389 = vst [vmem:[#allocation2 + $0x18] sm:$0xff] %v383_v43  ;;  %v2277_v42 = vld [vmem:[%s3141_s3 + $0x190] ss:$8 sps:$4 sm:$0xff]   ;;  %v2282_v43 = vld [vmem:[%s3141_s3 + $0x1a4] ss:$8 sps:$4 sm:$0xff]  }
 0x164   :  { %v2280_v44 = vld [vmem:[%s3141_s3 + $0x1a0] ss:$8 sps:$4 sm:$0xff]   ;;  %v2285_v45 = vld [vmem:[%s3141_s3 + $0x1b4] ss:$8 sps:$4 sm:$0xff]  }
 0x165   :  { %v371_v48 = vpop.f32.mrb[8].mxu0  ;;  %v418_v49 = vadd.f32 %v1626_v46, %v407_v47  ;;  %v2288_v47 = vld [vmem:[%s3141_s3 + $0x1c4] ss:$8 sps:$4 sm:$0xff]  }
 0x166   :  { %v373_v53 = vpop.f32.mrb[9].mxu0 }
 0x167   :  { %v384_v57 = vmax.f32 %v371_v48, %v373_v53  ;;  %v375_v58 = vpop.f32.mrb[10].mxu0  ;;  %v422_v59 = vmax.f32 %v418_v49, 0.0  ;;  %v2286_v48 = vld [vmem:[%s3141_s3 + $0x1c0] ss:$8 sps:$4 sm:$0xff]   ;;  %v2291_v49 = vld [vmem:[%s3141_s3 + $0x1d4] ss:$8 sps:$4 sm:$0xff]  }
 0x168   :  { %v394_v60 = vld [vmem:[#allocation2 + $0x10] ss:$2 sm:$0xf]  ;;  %v402_v61 = vld [vmem:[#allocation2 + $0x11] ss:$2 sm:$0xf] }
 0x169   :  { %v408_v63 = vmax.f32 %v394_v60, %v402_v61  ;;  %390 = vst [vmem:[#allocation2 + $0x20] sm:$0xff] %v384_v57  ;;  %v377_v0 = vpop.f32.mrb[11].mxu0  ;;  %426 = vst [vmem:[#allocation3] sm:$0xff] %v422_v59  ;;  %v2297_v53 = vld [vmem:[%s3141_s3 + $0x1f4] ss:$8 sps:$4 sm:$0xff]  }
 0x16a   :  { %v385_v3 = vmax.f32 %v375_v58, %v377_v0  ;;  %v2303_v61 = vld [vmem:[%s3141_s3 + $0x214] ss:$8 sps:$4 sm:$0xff]   ;;  %v2306_v0 = vld [vmem:[%s3141_s3 + $0x224] ss:$8 sps:$4 sm:$0xff]  }
 0x16b   :  { %v419_v4 = vadd.f32 %v1626_v46, %v408_v63  ;;  %v2355_v63 = vmov 0  }
 0x16c   :  { %391 = vst [vmem:[#allocation2 + $0x28] sm:$0xff] %v385_v3  ;;  %v2307_v3 = vld [vmem:[%s3141_s3 + $0x230] ss:$8 sps:$4 sm:$0xff]  }
 0x16d   :  { %v423_v6 = vmax.f32 %v419_v4, 0.0  ;;  %v2312_v4 = vld [vmem:[%s3141_s3 + $0x244] ss:$8 sps:$4 sm:$0xff]  }
 0x16f   :  { %427 = vst [vmem:[#allocation3 + $0x8] sm:$0xf] %v423_v6  ;;  %v2315_v6 = vld [vmem:[%s3141_s3 + $0x254] ss:$8 sps:$4 sm:$0xff]  }
 0x170   :  { %v396_v7 = vld [vmem:[#allocation2 + $0x18] ss:$2 sm:$0xff]  ;;  %v404_v8 = vld [vmem:[#allocation2 + $0x19] ss:$2 sm:$0xff] }
 0x171   :  { %v409_v9 = vmax.f32 %v396_v7, %v404_v8  ;;  %v2313_v7 = vld [vmem:[%s3141_s3 + $0x250] ss:$8 sps:$4 sm:$0xff]   ;;  %v2318_v8 = vld [vmem:[%s3141_s3 + $0x264] ss:$8 sps:$4 sm:$0xff]  }
 0x173   :  { %v398_v10 = vld [vmem:[#allocation2 + $0x28] ss:$2 sm:$0xf]  ;;  %v406_v11 = vld [vmem:[#allocation2 + $0x29] ss:$2 sm:$0xf]  ;;  %v420_v12 = vadd.f32 %v1626_v46, %v409_v9 }
 0x174   :  { %v410_v13 = vmax.f32 %v398_v10, %v406_v11  ;;  %v2316_v9 = vld [vmem:[%s3141_s3 + $0x260] ss:$8 sps:$4 sm:$0xff]   ;;  %v2321_v10 = vld [vmem:[%s3141_s3 + $0x274] ss:$8 sps:$4 sm:$0xff]   ;;  %v2319_v11 = vld [vmem:[%s3141_s3 + $0x270] ss:$8 sps:$4 sm:$0xff]  }
 0x175   :  { %v424_v14 = vmax.f32 %v420_v12, 0.0 }
 0x176   :  { %v421_v15 = vadd.f32 %v1626_v46, %v410_v13  ;;  %v432_v17 = vld [vmem:[#allocation3 + $0x1] sm:$0xff] }
 0x177   :  { %428 = vst [vmem:[#allocation3 + $0x10] sm:$0xff] %v424_v14  ;;  %v440_v22 = vpack.c.bf16 %v424_v14, %v422_v59  ;;  %v436_v23 = vld [vmem:[#allocation3 + $0x3] sm:$0xff] }
 0x178   :  { %v425_v16 = vmax.f32 %v421_v15, 0.0  ;;  %v2283_v46 = vld [vmem:[%s3141_s3 + $0x1b0] ss:$8 sps:$4 sm:$0xff]   ;;  %v2298_v59 = vld [vmem:[%s3141_s3 + $0x200] ss:$8 sps:$4 sm:$0xff]  }
 0x179   :  { %v434_v58 = vld [vmem:[#allocation3 + $0x2] sm:$0xff]  ;;  %v1714_v15 = vld [vmem:[%s3143_s5 + $0xb0] sm:$0xff] }
 0x17a   :  { %429 = vst [vmem:[#allocation3 + $0x18] sm:$0xf] %v425_v16  ;;  %v438_v13 = vld [vmem:[#allocation3 + $0x4] sm:$0xff] }
 0x17b   :  { %v1715_v16 = vld [vmem:[%s3143_s5 + $0xb8] sm:$0xff] }
 0x181   :  { %v433_v18 = vld [vmem:[#allocation3 + $0x11] sm:$0xff] }
 0x182   :  { %v437_v19 = vld [vmem:[#allocation3 + $0x13] sm:$0xff]  ;;  %v441_v20 = vpack.c.bf16 %v433_v18, %v432_v17  ;;  %v2003_v17 = vpack.c.bf16 %v1715_v16, %v1714_v15  ;;  %v1716_v18 = vld [vmem:[%s3143_s5 + $0xc0] sm:$0xff] }
 0x183   :  { %v443_v25 = vpack.c.bf16 %v437_v19, %v436_v23  ;;  %v435_v57 = vld [vmem:[#allocation3 + $0x12] sm:$0xff]  ;;  %v1079_v16 = vld [vmem:[%s3143_s5 + $0x20] sm:$0xff] }
 0x184   :  { %957 = vmatprep.mubr.bf16.mxu1 %v441_v20  ;;  %v442_v60 = vpack.c.bf16 %v435_v57, %v434_v58  ;;  %v439_v12 = vld [vmem:[#allocation3 + $0x14] sm:$0xff]  ;;  %2004 = vmatpush3.bf16.msra.mxu0 %v2003_v17 }
 0x185   :  { %958 = vmatmul.mubr.bf16.vlgmr.msra.gmra.mrb[0].mxu1 %v440_v22  ;;  %v444_v14 = vpack.c.bf16 %v439_v12, %v438_v13  ;;  %2005 = vmatprep.subr.bf16.mxu0 %v2354_v54  ;;  %v1717_v19 = vld [vmem:[%s3143_s5 + $0xc8] sm:$0xff]  ;;  %v1719_v22 = vld [vmem:[%s3143_s5 + $0xd8] sm:$0xff] }
 0x186   :  { %969 = vmatpush1.bf16.msra.mxu1 %v2250_v21  ;;  %1000 = vmatprep.mubr.bf16.mxu1 %v443_v25  ;;  %v2006_v20 = vpack.c.bf16 %v1717_v19, %v1716_v18  ;;  %v1718_v21 = vld [vmem:[%s3143_s5 + $0xd0] sm:$0xff]  ;;  %v1720_v25 = vld [vmem:[%s3143_s5 + $0xe0] sm:$0xff]  ;;  %v1076_v57 = vld [vmem:[%s3143_s5 + $0x8] sm:$0xff] }
 0x187   :  { %970 = vmatprep.subr.bf16.mxu1 %v2255_v24  ;;  %v2009_v23 = vpack.c.bf16 %v1719_v22, %v1718_v21  ;;  %v2357_v24 = vmov 0.0   ;;  %v1080_v17 = vld [vmem:[%s3143_s5 + $0x28] sm:$0xff]  ;;  %v1082_v21 = vld [vmem:[%s3143_s5 + $0x38] sm:$0xff] }
 0x188   :  { %2007 = vmatpush3.bf16.msra.mxu0 %v2006_v20  ;;  %1868 = vmatprep.mubr.msk.f32.mxu0 %vm2356_vm6, %v2357_v24  ;;  %v2024_v19 = vpack.c.bf16 %v1080_v17, %v1079_v16  ;;  %v1081_v20 = vld [vmem:[%s3143_s5 + $0x30] sm:$0xff]  ;;  %v1744_v16 = vld [vmem:[%s3143_s5 + $0x1a0] sm:$0xff]  ;;  %v1745_v17 = vld [vmem:[%s3143_s5 + $0x1a8] sm:$0xff] }
 0x189   :  { %2008 = vmatprep.subr.bf16.mxu0 %v2354_v54  ;;  %v2027_v22 = vpack.c.bf16 %v1082_v21, %v1081_v20  ;;  %v1747_v20 = vld [vmem:[%s3143_s5 + $0x1b8] sm:$0xff] }
 0x18a   :  { %971 = vmatpush1.bf16.msra.mxu1 %v2253_v26  ;;  %v1721_v26 = vld [vmem:[%s3143_s5 + $0xe8] sm:$0xff] }
 0x18b   :  { %972 = vmatprep.subr.bf16.mxu1 %v2258_v27  ;;  %v2012_v27 = vpack.c.bf16 %v1721_v26, %v1720_v25  ;;  %v1084_v25 = vld [vmem:[%s3143_s5 + $0x48] sm:$0xff] }
 0x18c   :  { %2010 = vmatpush3.bf16.msra.mxu0 %v2009_v23  ;;  %v1083_v23 = vld [vmem:[%s3143_s5 + $0x40] sm:$0xff] }
 0x18d   :  { %2011 = vmatprep.subr.bf16.mxu0 %v2354_v54 }
 0x18e   :  { %973 = vmatpush1.bf16.msra.mxu1 %v2256_v28  ;;  %v1722_v28 = vld [vmem:[%s3143_s5 + $0xf0] sm:$0xff] }
 0x18f   :  { %974 = vmatprep.subr.bf16.mxu1 %v2261_v29  ;;  %v1723_v29 = vld [vmem:[%s3143_s5 + $0xf8] sm:$0xff] }
 0x190   :  { %2013 = vmatpush3.bf16.msra.mxu0 %v2012_v27 }
 0x191   :  { %2014 = vmatprep.subr.bf16.mxu0 %v2354_v54 }
 0x192   :  { %975 = vmatpush1.bf16.msra.mxu1 %v2259_v30  ;;  %v2015_v30 = vpack.c.bf16 %v1723_v29, %v1722_v28  ;;  %v2030_v28 = vpack.c.bf16 %v1084_v25, %v1083_v23  ;;  %v1085_v29 = vld [vmem:[%s3143_s5 + $0x50] sm:$0xff]  ;;  %v1749_v23 = vld [vmem:[%s3143_s5 + $0x1c8] sm:$0xff] }
 0x193   :  { %976 = vmatprep.subr.bf16.mxu1 %v2264_v31 }
 0x194   :  { %2016 = vmatpush3.bf16.msra.mxu0 %v2015_v30  ;;  %v1086_v30 = vld [vmem:[%s3143_s5 + $0x58] sm:$0xff] }
 0x195   :  { %2017 = vmatprep.subr.bf16.mxu0 %v2354_v54 }
 0x196   :  { %977 = vmatpush1.bf16.msra.mxu1 %v2262_v32 }
 0x197   :  { %978 = vmatprep.subr.bf16.mxu1 %v2267_v33 }
 0x19a   :  { %979 = vmatpush1.bf16.msra.mxu1 %v2265_v34 }
 0x19b   :  { %980 = vmatprep.subr.bf16.mxu1 %v2270_v35 }
 0x19e   :  { %981 = vmatpush1.bf16.msra.mxu1 %v2268_v36 }
 0x19f   :  { %982 = vmatprep.subr.bf16.mxu1 %v2273_v37 }
 0x1a2   :  { %983 = vmatpush1.bf16.msra.mxu1 %v2271_v38 }
 0x1a3   :  { %984 = vmatprep.subr.bf16.mxu1 %v2276_v39 }
 0x1a6   :  { %985 = vmatpush1.bf16.msra.mxu1 %v2274_v40 }
 0x1a7   :  { %986 = vmatprep.subr.bf16.mxu1 %v2279_v41 }
 0x1aa   :  { %987 = vmatpush1.bf16.msra.mxu1 %v2277_v42  ;;  %v2900_v42 = vld [vmem:[%s3142_s4] ss:$0 sm:$0xff] }
 0x1ab   :  { %988 = vmatprep.subr.bf16.mxu1 %v2282_v43 }
 0x1ae   :  { %989 = vmatpush1.bf16.msra.mxu1 %v2280_v44 }
 0x1af   :  { %990 = vmatprep.subr.bf16.mxu1 %v2285_v45 }
 0x1b2   :  { %991 = vmatpush1.bf16.msra.mxu1 %v2283_v46 }
 0x1b3   :  { %992 = vmatprep.subr.bf16.mxu1 %v2288_v47 }
 0x1b6   :  { %993 = vmatpush1.bf16.msra.mxu1 %v2286_v48 }
 0x1b7   :  { %994 = vmatprep.subr.bf16.mxu1 %v2291_v49 }
 0x1ba   :  { %995 = vmatpush1.bf16.msra.mxu1 %v2289_v50 }
 0x1bb   :  { %996 = vmatprep.subr.bf16.mxu1 %v2294_v51 }
 0x1be   :  { %997 = vmatpush1.bf16.msra.mxu1 %v2292_v52 }
 0x1bf   :  { %998 = vmatprep.subr.bf16.mxu1 %v2297_v53 }
 0x1c2   :  { %999 = vmatpush1.bf16.msra.mxu1 %v2295_v55 }
 0x1c3   :  { %1011 = vmatprep.subr.bf16.mxu1 %v2300_v56  ;;  %v1075_v56 = vld [vmem:[%s3143_s5] sm:$0xff] }
 0x1c5   :  { %1001 = vmatmul.mubr.bf16.vlgmr.msra.gmra.mrb[0].mxu1 %v442_v60 }
 0x1c6   :  { %1012 = vmatpush1.bf16.msra.mxu1 %v2298_v59  ;;  %1043 = vmatprep.mubr.bf16.mxu1 %v2355_v63 }
 0x1c7   :  { %1013 = vmatprep.subr.bf16.mxu1 %v2303_v61 }
 0x1ca   :  { %1014 = vmatpush1.bf16.msra.mxu1 %v2301_v62 }
 0x1cb   :  { %1015 = vmatprep.subr.bf16.mxu1 %v2306_v0  ;;  %v2018_v0 = vpack.c.bf16 %v1076_v57, %v1075_v56  ;;  %v1729_v56 = vld [vmem:[%s3143_s5 + $0x128] sm:$0xff] }
 0x1ce   :  { %1016 = vmatpush1.bf16.msra.mxu1 %v2304_v1 }
 0x1cf   :  { %1017 = vmatprep.subr.bf16.mxu1 %v2309_v2 }
 0x1d2   :  { %1018 = vmatpush1.bf16.msra.mxu1 %v2307_v3 }
 0x1d3   :  { %1019 = vmatprep.subr.bf16.mxu1 %v2312_v4 }
 0x1d6   :  { %1020 = vmatpush1.bf16.msra.mxu1 %v2310_v5 }
 0x1d7   :  { %1021 = vmatprep.subr.bf16.mxu1 %v2315_v6  ;;  %v1077_v6 = vld [vmem:[%s3143_s5 + $0x10] sm:$0xff] }
 0x1da   :  { %1022 = vmatpush1.bf16.msra.mxu1 %v2313_v7  ;;  %v1078_v7 = vld [vmem:[%s3143_s5 + $0x18] sm:$0xff] }
 0x1db   :  { %1023 = vmatprep.subr.bf16.mxu1 %v2318_v8  ;;  %v2021_v13 = vpack.c.bf16 %v1078_v7, %v1077_v6  ;;  %v1738_v6 = vld [vmem:[%s3143_s5 + $0x170] sm:$0xff]  ;;  %v1739_v7 = vld [vmem:[%s3143_s5 + $0x178] sm:$0xff] }
 0x1de   :  { %1024 = vmatpush1.bf16.msra.mxu1 %v2316_v9 }
 0x1df   :  { %1025 = vmatprep.subr.bf16.mxu1 %v2321_v10 }
 0x1e2   :  { %1026 = vmatpush1.bf16.msra.mxu1 %v2319_v11 }
 0x1e3   :  { %2089 = vmatprep.subr.bf16.mxu1 %v2354_v54 }
 0x1e5   :  { %1044 = vmatmul.mubr.bf16.vlgmr.msra.gmra.mrb[0].mxu1 %v444_v14 }
 0x1e6   :  { %1990 = vmatprep.mubr.msk.f32.mxu1 %vm2356_vm6, %v2357_v24 }
 0x2b8   :  { %v1045_v31 = vpop.f32.mrb[0].mxu1 }
 0x2b9   :  { %v1047_v32 = vpop.f32.mrb[1].mxu1 }
 0x2ba   :  { %v1054_v33 = vmax.f32 %v1045_v31, %v1047_v32  ;;  %v1049_v34 = vpop.f32.mrb[2].mxu1  ;;  %v2033_v32 = vpack.c.bf16 %v1086_v30, %v1085_v29  ;;  %v1752_v29 = vld [vmem:[%s3143_s5 + $0x1e0] sm:$0xff]  ;;  %v1753_v30 = vld [vmem:[%s3143_s5 + $0x1e8] sm:$0xff] }
 0x2bb   :  { %v1051_v35 = vpop.f32.mrb[3].mxu1 }
 0x2bc   :  { %1056 = vst [vmem:[#allocation4] sm:$0xff] %v1054_v33  ;;  %v1055_v36 = vmax.f32 %v1049_v34, %v1051_v35  ;;  %v1087_v33 = vld [vmem:[%s3143_s5 + $0x60] sm:$0xff]  ;;  %v1088_v34 = vld [vmem:[%s3143_s5 + $0x68] sm:$0xff] }
 0x2be   :  { %1057 = vst [vmem:[#allocation4 + $0x8] sm:$0xff] %v1055_v36 }
 0x2c3   :  { %v1091_v37 = vld [vmem:[#allocation4 + $0x2] sm:$0x1]  ;;  %v1093_v38 = vld [vmem:[#allocation4 + $0x3] sm:$0x1]  ;;  %v1269_v40 = vld [vmem:[#allocation4 + $0x4] sm:$0x1] }
 0x2c4   :  { %v1095_v39 = vmax.f32 %v1091_v37, %v1093_v38  ;;  %v1271_v41 = vld [vmem:[#allocation4 + $0x5] sm:$0x1]  ;;  %v1372_v50 = vld [vmem:[#allocation4 + $0x6] sm:$0x1]  ;;  %v1374_v52 = vld [vmem:[#allocation4 + $0x7] sm:$0x1]  ;;  %v2036_v38 = vpack.c.bf16 %v1088_v34, %v1087_v33 }
 0x2c5   :  { %v1092_v43 = vld [vmem:[#allocation4 + $0xa] sm:$0x1]  ;;  %v1094_v44 = vld [vmem:[#allocation4 + $0xb] sm:$0x1]  ;;  %v1273_v45 = vmax.f32 %v1269_v40, %v1271_v41  ;;  %v1270_v47 = vld [vmem:[#allocation4 + $0xc] sm:$0x1]  ;;  %v1376_v59 = vmax.f32 %v1372_v50, %v1374_v52 }
 0x2c6   :  { %v1096_v46 = vmax.f32 %v1092_v43, %v1094_v44  ;;  %v1272_v48 = vld [vmem:[#allocation4 + $0xd] sm:$0x1]  ;;  %v1373_v51 = vld [vmem:[#allocation4 + $0xe] sm:$0x1]  ;;  %v1097_v53 = vadd.f32 %v2900_v42, %v1095_v39  ;;  %v1375_v58 = vld [vmem:[#allocation4 + $0xf] sm:$0x1] }
 0x2c7   :  { %v1274_v49 = vmax.f32 %v1270_v47, %v1272_v48  ;;  %v1275_v60 = vadd.f32 %v2900_v42, %v1273_v45  ;;  %v1377_v63 = vmax.f32 %v1373_v51, %v1375_v58  ;;  %v1378_v4 = vadd.f32 %v2900_v42, %v1376_v59  ;;  %v1059_v26 = vld [vmem:[#allocation4 + $0x8] sm:$0x1]  ;;  %v1061_v27 = vld [vmem:[#allocation4 + $0x9] sm:$0x1]  ;;  %v1058_v35 = vld [vmem:[#allocation4] sm:$0x1] }
 0x2c8   :  { %v1098_v55 = vadd.f32 %v2900_v42, %v1096_v46  ;;  %v1099_v2 = vmax.f32 %v1097_v53, 0.0  ;;  %v1063_v31 = vmax.f32 %v1059_v26, %v1061_v27  ;;  %v1060_v36 = vld [vmem:[#allocation4 + $0x1] sm:$0x1]  ;;  %v1089_v40 = vld [vmem:[%s3143_s5 + $0x70] sm:$0xff]  ;;  %v1724_v46 = vld [vmem:[%s3143_s5 + $0x100] sm:$0xff] }
 0x2c9   :  { %v1276_v61 = vadd.f32 %v2900_v42, %v1274_v49  ;;  %v1379_v5 = vadd.f32 %v2900_v42, %v1377_v63  ;;  %v1277_v8 = vmax.f32 %v1275_v60, 0.0  ;;  %v1380_v14 = vmax.f32 %v1378_v4, 0.0  ;;  %v1090_v41 = vld [vmem:[%s3143_s5 + $0x78] sm:$0xff]  ;;  %v1725_v47 = vld [vmem:[%s3143_s5 + $0x108] sm:$0xff]  ;;  %v1730_v58 = vld [vmem:[%s3143_s5 + $0x130] sm:$0xff] }
 0x2ca   :  { %v1100_v62 = vmax.f32 %v1098_v55, 0.0  ;;  %v1072_v37 = vadd.f32 %v2900_v42, %v1063_v31  ;;  %v1062_v39 = vmax.f32 %v1058_v35, %v1060_v36  ;;  %v2039_v44 = vpack.c.bf16 %v1090_v41, %v1089_v40  ;;  %v1727_v51 = vld [vmem:[%s3143_s5 + $0x118] sm:$0xff]  ;;  %v1728_v55 = vld [vmem:[%s3143_s5 + $0x120] sm:$0xff]  ;;  %v1737_v4 = vld [vmem:[%s3143_s5 + $0x168] sm:$0xff] }
 0x2cb   :  { %v1278_v1 = vmax.f32 %v1276_v61, 0.0  ;;  %v1381_v11 = vmax.f32 %v1379_v5, 0.0  ;;  %v2042_v50 = vpack.c.bf16 %v1725_v47, %v1724_v46  ;;  %v2048_v57 = vpack.c.bf16 %v1729_v56, %v1728_v55  ;;  %v1731_v59 = vld [vmem:[%s3143_s5 + $0x138] sm:$0xff]  ;;  %v1732_v61 = vld [vmem:[%s3143_s5 + $0x140] sm:$0xff]  ;;  %v1750_v26 = vld [vmem:[%s3143_s5 + $0x1d0] sm:$0xff] }
 0x2cc   :  { %v1120_v3 = vrot.slane %v1100_v62, 7  ;;  %v1074_v43 = vmax.f32 %v1072_v37, 0.0  ;;  %v1071_v45 = vadd.f32 %v2900_v42, %v1062_v39  ;;  %v1726_v42 = vld [vmem:[%s3143_s5 + $0x110] sm:$0xff]  ;;  %v2051_v60 = vpack.c.bf16 %v1731_v59, %v1730_v58  ;;  %v1733_v62 = vld [vmem:[%s3143_s5 + $0x148] sm:$0xff]  ;;  %v1751_v27 = vld [vmem:[%s3143_s5 + $0x1d8] sm:$0xff] }
 0x2cd   :  { %v1298_v9 = vrot.slane %v1278_v1, 7  ;;  %v1401_v15 = vrot.slane %v1381_v11, 7  ;;  %v2045_v53 = vpack.c.bf16 %v1727_v51, %v1726_v42  ;;  %v2054_v63 = vpack.c.bf16 %v1733_v62, %v1732_v61  ;;  %v1735_v1 = vld [vmem:[%s3143_s5 + $0x158] sm:$0xff]  ;;  %v1484_v35 = vld [vmem:[%s3145_s7] sm:$0xff]  ;;  %v1485_v36 = vld [vmem:[%s3145_s7 + $0x8] sm:$0xff] }
 0x2ce   :  { %v1122_v10 = vsel %vm1121_vm7, %v1120_v3, %v1099_v2  ;;  %v1196_v48 = vrot.slane %v1074_v43, 7  ;;  %v1073_v49 = vmax.f32 %v1071_v45, 0.0  ;;  %v1736_v3 = vld [vmem:[%s3143_s5 + $0x160] sm:$0xff]  ;;  %v2084_v31 = vpack.c.bf16 %v1753_v30, %v1752_v29  ;;  %v1755_v33 = vld [vmem:[%s3143_s5 + $0x1f8] sm:$0xff]  ;;  %v1486_v37 = vld [vmem:[%s3145_s7 + $0x10] sm:$0xff] }
 0x2cf   :  { %1869 = vmatmul.mubr.f32.vlgmr.msra.gmra.mrb[12].mxu0 %v1122_v10  ;;  %v2922_v12 = vsel %vm1121_vm7, %v1298_v9, %v1277_v8  ;;  %v2934_v18 = vsel %vm1121_vm7, %v1401_v15, %v1380_v14  ;;  %v2060_v5 = vpack.c.bf16 %v1737_v4, %v1736_v3  ;;  %v2063_v8 = vpack.c.bf16 %v1739_v7, %v1738_v6  ;;  %v1740_v9 = vld [vmem:[%s3143_s5 + $0x180] sm:$0xff]  ;;  %v1741_v10 = vld [vmem:[%s3143_s5 + $0x188] sm:$0xff]  ;;  %v1743_v14 = vld [vmem:[%s3143_s5 + $0x198] sm:$0xff] }
 0x2d0   :  { %2019 = vmatpush3.bf16.msra.mxu0 %v2018_v0  ;;  %1903 = vmatprep.mubr.msk.f32.mxu0 %vm2356_vm6, %v2357_v24  ;;  %v1197_v52 = vsel %vm1121_vm7, %v1196_v48, %v1073_v49  ;;  %v1734_v0 = vld [vmem:[%s3143_s5 + $0x150] sm:$0xff]  ;;  %v2066_v11 = vpack.c.bf16 %v1741_v10, %v1740_v9  ;;  %v1487_v39 = vld [vmem:[%s3145_s7 + $0x18] sm:$0xff]  ;;  %v1489_v41 = vld [vmem:[%s3145_s7 + $0x28] sm:$0xff] }
 0x2d1   :  { %2020 = vmatprep.subr.bf16.mxu0 %v2354_v54  ;;  %v2057_v2 = vpack.c.bf16 %v1735_v1, %v1734_v0  ;;  %v2093_v40 = vpack.c.bf16 %v1487_v39, %v1486_v37 }
 0x2d4   :  { %2022 = vmatpush3.bf16.msra.mxu0 %v2021_v13  ;;  %v1742_v13 = vld [vmem:[%s3143_s5 + $0x190] sm:$0xff] }
 0x2d5   :  { %2023 = vmatprep.subr.bf16.mxu0 %v2354_v54  ;;  %v2069_v15 = vpack.c.bf16 %v1743_v14, %v1742_v13 }
 0x2d8   :  { %2025 = vmatpush3.bf16.msra.mxu0 %v2024_v19  ;;  %v2072_v19 = vpack.c.bf16 %v1745_v17, %v1744_v16 }
 0x2d9   :  { %2026 = vmatprep.subr.bf16.mxu0 %v2354_v54 }
 0x2dc   :  { %2028 = vmatpush3.bf16.msra.mxu0 %v2027_v22  ;;  %v1748_v22 = vld [vmem:[%s3143_s5 + $0x1c0] sm:$0xff] }
 0x2dd   :  { %2029 = vmatprep.subr.bf16.mxu0 %v2354_v54  ;;  %v2078_v25 = vpack.c.bf16 %v1749_v23, %v1748_v22 }
 0x2e0   :  { %2031 = vmatpush3.bf16.msra.mxu0 %v2030_v28  ;;  %v2081_v28 = vpack.c.bf16 %v1751_v27, %v1750_v26 }
 0x2e1   :  { %2032 = vmatprep.subr.bf16.mxu0 %v2354_v54 }
 0x2e4   :  { %2034 = vmatpush3.bf16.msra.mxu0 %v2033_v32  ;;  %v1754_v32 = vld [vmem:[%s3143_s5 + $0x1f0] sm:$0xff] }
 0x2e5   :  { %2035 = vmatprep.subr.bf16.mxu0 %v2354_v54  ;;  %v2087_v34 = vpack.c.bf16 %v1755_v33, %v1754_v32 }
 0x2e8   :  { %2037 = vmatpush3.bf16.msra.mxu0 %v2036_v38  ;;  %v2090_v38 = vpack.c.bf16 %v1485_v36, %v1484_v35 }
 0x2e9   :  { %2038 = vmatprep.subr.bf16.mxu0 %v2354_v54 }
 0x2ea   :  { %2091 = vmatpush3.bf16.msra.mxu1 %v2090_v38 }
 0x2eb   :  { %2092 = vmatprep.subr.bf16.mxu1 %v2354_v54 }
 0x2ec   :  { %2040 = vmatpush3.bf16.msra.mxu0 %v2039_v44  ;;  %v1490_v44 = vld [vmem:[%s3145_s7 + $0x30] sm:$0x3] }
 0x2ed   :  { %2041 = vmatprep.subr.bf16.mxu0 %v2354_v54 }
 0x2ee   :  { %2094 = vmatpush3.bf16.msra.mxu1 %v2093_v40 }
 0x2ef   :  { %1904 = vmatmul.mubr.f32.vlgmr.msra.gmra.mrb[14].mxu0 %v1197_v52  ;;  %2095 = vmatprep.subr.bf16.mxu1 %v2354_v54  ;;  %v1756_v52 = vld [vmem:[%s3144_s6] ss:$0 sm:$0xff]  ;;  %s2358_s6 = smov [#allocation5]  }
 0x2f0   :  { %2043 = vmatpush3.bf16.msra.mxu0 %v2042_v50  ;;  %1938 = vmatprep.mubr.msk.f32.mxu0 %vm2356_vm6, %v2357_v24 }
 0x2f1   :  { %2044 = vmatprep.subr.bf16.mxu0 %v2354_v54 }
 0x2f4   :  { %2046 = vmatpush3.bf16.msra.mxu0 %v2045_v53 }
 0x2f5   :  { %2047 = vmatprep.subr.bf16.mxu0 %v2354_v54 }
 0x2f8   :  { %2049 = vmatpush3.bf16.msra.mxu0 %v2048_v57  ;;  %v1757_v57 = vld [vmem:[%s3146_s8] ss:$0 sm:$0xff]  ;;  %s1596_s8 = sshll.u32 %s2358_s6, 4  ;;  %s1597_s8 = int_to_ptr.vmem [resolvable:$true] %s1596_s8 }
 0x2f9   :  { %2050 = vmatprep.subr.bf16.mxu0 %v2354_v54  ;;  %s2326_s3 = scalar_lea.vmem %s1597_s8, 32  ;;  %p2331_p1 = scmp.lt.s32.totalorder %s1597_s8, %s1597_s8 }
 0x2fa   :  { %p2327_p0 = scmp.ne.s32.totalorder %s1597_s8, %s2326_s3  ;;  %p2332_p2 = scmp.lt.s32.totalorder %s2326_s3, %s2326_s3 }
 0x2fc   :  { %2052 = vmatpush3.bf16.msra.mxu0 %v2051_v60  ;;  %p2333_p3 = por %p2332_p2, %p2331_p1 }
 0x2fd   :  { %2053 = vmatprep.subr.bf16.mxu0 %v2354_v54 }
 0x2fe   :  { %p2334_p4 = pnand %p2333_p3, %p2327_p0 }
 0x300   :  { %2055 = vmatpush3.bf16.msra.mxu0 %v2054_v63 }
 0x301   :  { %2056 = vmatprep.subr.bf16.mxu0 %v2354_v54 }
 0x304   :  { %2058 = vmatpush3.bf16.msra.mxu0 %v2057_v2 }
 0x305   :  { %2059 = vmatprep.subr.bf16.mxu0 %v2354_v54 }
 0x308   :  { %2061 = vmatpush3.bf16.msra.mxu0 %v2060_v5 }
 0x309   :  { %2062 = vmatprep.subr.bf16.mxu0 %v2354_v54 }
 0x30c   :  { %2064 = vmatpush3.bf16.msra.mxu0 %v2063_v8 }
 0x30d   :  { %2065 = vmatprep.subr.bf16.mxu0 %v2354_v54 }
 0x30f   :  { %1939 = vmatmul.mubr.f32.vlgmr.msra.gmra.mrb[16].mxu0 %v2922_v12  ;;  %v1746_v12 = vld [vmem:[%s3143_s5 + $0x1b0] sm:$0xff] }
 0x310   :  { %2067 = vmatpush3.bf16.msra.mxu0 %v2066_v11  ;;  %1973 = vmatprep.mubr.msk.f32.mxu0 %vm2356_vm6, %v2357_v24  ;;  %v2075_v21 = vpack.c.bf16 %v1747_v20, %v1746_v12 }
 0x311   :  { %2068 = vmatprep.subr.bf16.mxu0 %v2354_v54 }
 0x314   :  { %2070 = vmatpush3.bf16.msra.mxu0 %v2069_v15 }
 0x315   :  { %2071 = vmatprep.subr.bf16.mxu0 %v2354_v54 }
 0x318   :  { %2073 = vmatpush3.bf16.msra.mxu0 %v2072_v19 }
 0x319   :  { %2074 = vmatprep.subr.bf16.mxu0 %v2354_v54 }
 0x31c   :  { %2076 = vmatpush3.bf16.msra.mxu0 %v2075_v21 }
 0x31d   :  { %2077 = vmatprep.subr.bf16.mxu0 %v2354_v54 }
 0x320   :  { %2079 = vmatpush3.bf16.msra.mxu0 %v2078_v25 }
 0x321   :  { %2080 = vmatprep.subr.bf16.mxu0 %v2354_v54 }
 0x324   :  { %2082 = vmatpush3.bf16.msra.mxu0 %v2081_v28 }
 0x325   :  { %2083 = vmatprep.subr.bf16.mxu0 %v2354_v54 }
 0x328   :  { %2085 = vmatpush3.bf16.msra.mxu0 %v2084_v31 }
 0x329   :  { %2086 = vmatprep.subr.bf16.mxu0 %v2354_v54 }
 0x32c   :  { %2088 = vmatpush3.bf16.msra.mxu0 %v2087_v34 }
 0x32f   :  { %1974 = vmatmul.mubr.f32.vlgmr.msra.gmra.mrb[18].mxu0 %v2934_v18  ;;  %v1488_v18 = vld [vmem:[%s3145_s7 + $0x20] sm:$0xff] }
 0x330   :  { %v2096_v43 = vpack.c.bf16 %v1489_v41, %v1488_v18 }
 0x332   :  { %2097 = vmatpush3.bf16.msra.mxu1 %v2096_v43 }
 0x333   :  { %1988 = vmatprep.subr.mxu1 %v2357_v24 }
 0x336   :  { %1989 = vmatpush3.msk.msra.mxu1 %vm1502_vm8, %v1490_v44 }
 0x3a2   :  { %v1190_v45 = vpop.f32.mrb[12].mxu0 }
 0x3a3   :  { %v1870_v54 = vpop.f32.mrb[13].mxu0 }
 0x3c2   :  { %v1265_v46 = vpop.f32.mrb[14].mxu0 }
 0x3c3   :  { %v1266_v47 = vadd.f32 %v1265_v46, %v1190_v45  ;;  %v1905_v48 = vpop.f32.mrb[15].mxu0 }
 0x3e2   :  { %v1367_v49 = vpop.f32.mrb[16].mxu0 }
 0x3e3   :  { %v1371_v50 = vadd.f32 %v1367_v49, %v1266_v47  ;;  %v1940_v42 = vpop.f32.mrb[17].mxu0 }
 0x402   :  { %v1470_v51 = vpop.f32.mrb[18].mxu0 }
 0x403   :  { %v1474_v24 = vadd.f32 %v1470_v51, %v1371_v50  ;;  %v1975_v53 = vpop.f32.mrb[19].mxu0 }
 0x405   :  { %v1482_v55 = vadd.f32 %v1756_v52, %v1474_v24 }
 0x407   :  { %v1483_v56 = vmax.f32 %v1482_v55, 0.0 }
 0x409   :  { %1991 = vmatmul.mubr.msk.f32.vlgmr.msra.gmra.mrb[4].mxu1 %vm1498_vm9, %v1483_v56 }
 0x4dc   :  { %v1572_v58 = vpop.f32.mrb[4].mxu1 }
 0x4dd   :  { %v1573_v59 = vadd.f32 %v1757_v57, %v1572_v58  ;;  %v1992_v60 = vpop.f32.mrb[5].mxu1 }
 0x4df   :  { %v1577_v61 = vsel %vm1576_vm10, %v1573_v59, -inf }
 0x4e0   :  { %1578 = vmax.xlane.f32.xlu0 %v1577_v61 }
 0x56d   :  { %v1579_v62 = vpop.xlane.xlu0 %1578 }
 0x56e   :  { %v1580_v63 = vsub.f32 %v1573_v59, %v1579_v62 }
 0x570   :  { %v1581_v0 = vmul.f32 1.442695, %v1580_v63 }
 0x572   :  { %2322 = vpow2.f32 %v1581_v0 }
 0x57c   :  { %v2323_v1 = vpop.eup %2322 }
 0x57d   :  { %v1583_v2 = vsel %vm1576_vm10, %v2323_v1, 0.0 }
 0x57e   :  { %1584 = vadd.xlane.f32.xlu1 %v1583_v2 }
 0x60b   :  { %v1585_v3 = vpop.xlane.xlu1 %1584 }
 0x60c   :  { %2324 = vlog2.f32 %v1585_v3 }
 0x616   :  { %v2325_v4 = vpop.eup %2324 }
 0x617   :  { %v1587_v5 = vmul.f32 0.6931472, %v2325_v4 }
 0x619   :  { %v1588_v6 = vsub.f32 %v1580_v63, %v1587_v5 }
 0x61b   :  { %1589 = vst.msk [vmem:[#allocation5] sm:$0x3] %vm1576_vm10, %v1588_v6 }
 0x61c   :  { %2337 = shalt.err (!%p2334_p4)
}
 0x61d   :  { %s2338_s27 = scalar_lea.hbm %s3147_s9, 32 }
 0x61e   :  { %p2339_p5 = scmp.ne.s32.totalorder %s3147_s9, %s2338_s27  ;;  %p2342_p6 = scmp.lt.u32.totalorder %s2338_s27, %s3147_s9 }
 0x620   :  { %p2344_p7 = pnand %p2342_p6, %p2339_p5 }
 0x622   :  { %2347 = shalt.err (!%p2344_p7)
}
 0x623   :  { %1599 = dma.vmem_to_hbm [thread:$0]  %s1597_s8, 32, %s3147_s9, [#allocation6]  }
 0x624   :  { %2348 = dma.done.wait [#allocation6], 32  }
 0x625   :  { %2349 = vsyncadd [#allocation6], 4294967264 }
 0x626   :  { %1603 = vsyncpa [#allocation6], 1 }

</bundles_post_ra>
